<compile_context>
chip_gen: v7x
topology: tpu7x:2x2x1
jax: 0.10.0
libtpu: 0.0.40
codegen_flags: <defaults>
</compile_context>

<pallas_src>
import functools
import math

import jax
import jax.numpy as jnp
import numpy as np
from jax.experimental import pallas as pl
from jax.experimental.pallas import tpu as pltpu

# --- small DenseNet-BC configuration (same topology as the reference) ---
GROWTH = 8            # growth_rate
BLOCK_CONFIG = (2, 2) # block_config
NUM_INIT = 16         # num_init_features
BN_SIZE = 2           # bn_size
NUM_CLASSES = 10      # num_classes
BN_EPS = 1e-5
BN_SCALE = 1.0 / math.sqrt(1.0 + BN_EPS)   # eval-mode BN at init: y = x * BN_SCALE
LANE = 128

_VMEM = pl.BlockSpec(memory_space=pltpu.MemorySpace.VMEM)


# ---------------- geometry & host-side constant matrices ----------------
def _geom(n, h, w):
    hp, wp = h + 2, w + 2
    mp = n * hp * wp           # padded-flat interior+ring length
    s = wp + 1                 # halo on each side (covers the max 3x3 shift)
    mtot = -(-(mp + 2 * s) // LANE) * LANE   # lane-aligned slab width
    return dict(n=n, h=h, w=w, hp=hp, wp=wp, mp=mp, s=s, mtot=mtot)


def _pf_index(g, ni, hi, wi):
    return g["s"] + ni * g["hp"] * g["wp"] + (hi + 1) * g["wp"] + (wi + 1)


def _interior_mask(g):
    """(1, mp) f32: 1 at real (n,h,w) positions, 0 on the zero ring."""
    m = np.zeros((g["n"], g["hp"], g["wp"]), np.float32)
    m[:, 1:-1, 1:-1] = 1.0
    return jnp.asarray(m.reshape(1, g["mp"]))


def _place_matrix(g):
    """(n*h*w, mtot) 0/1: scatter dense (n,h,w) columns into padded-flat positions."""
    pm = np.zeros((g["n"] * g["h"] * g["w"], g["mtot"]), np.float32)
    i = 0
    for ni in range(g["n"]):
        for hi in range(g["h"]):
            for wi in range(g["w"]):
                pm[i, _pf_index(g, ni, hi, wi)] = 1.0
                i += 1
    return jnp.asarray(pm, jnp.bfloat16)


def _pool_matrix(g_in, g_out):
    """(mtot_in, mtot_out): fused 2x2/s2 avg-pool + repack to next block's padded-flat."""
    pm = np.zeros((g_in["mtot"], g_out["mtot"]), np.float32)
    for ni in range(g_in["n"]):
        for hi in range(g_in["h"]):
            for wi in range(g_in["w"]):
                pm[_pf_index(g_in, ni, hi, wi),
                   _pf_index(g_out, ni, hi // 2, wi // 2)] = 0.25
    return jnp.asarray(pm, jnp.bfloat16)


def _gap_matrix(g):
    """(mtot, n) f32: global average pool over each image's interior positions."""
    am = np.zeros((g["mtot"], g["n"]), np.float32)
    for ni in range(g["n"]):
        for hi in range(g["h"]):
            for wi in range(g["w"]):
                am[_pf_index(g, ni, hi, wi), ni] = 1.0 / float(g["h"] * g["w"])
    return jnp.asarray(am)


# ---------------- Pallas kernels ----------------
def _dense_layer_step(feats, mask_int, w1, w2cat, mp, wp):
    """One DenseLayer on the VMEM-resident padded-flat slab (pure values, no HBM).

    feats:    (Cin, Mtot) f32, ring/halo zero.
    mask_int: (1, mp) f32 interior mask.
    w1:       (16, Cin) bf16  (norm1 scale folded)
    w2cat:    (8, 144) bf16   (norm2 scale folded, K ordered as tap-major, cin-minor)
    returns   (Cin + GROWTH, Mtot) f32 with ring/halo of the new rows zeroed.
    """
    s = wp + 1
    mtot = feats.shape[1]
    g = w2cat.shape[0]
    xr = jnp.maximum(feats, 0.0).astype(jnp.bfloat16)                 # relu1
    h = jnp.dot(w1, xr, preferred_element_type=jnp.float32)           # conv1 (1x1)
    h = jnp.maximum(h, 0.0).astype(jnp.bfloat16)                      # relu2
    # conv2 (3x3, pad 1) as ONE K = 9*Cmid matmul over lane-shifted copies of h.
    hcat = jnp.concatenate(
        [h[:, s + di * wp + dj: s + di * wp + dj + mp]
         for di in (-1, 0, 1) for dj in (-1, 0, 1)], axis=0)          # (144, mp)
    new = jnp.dot(w2cat, hcat, preferred_element_type=jnp.float32) * mask_int
    new_pf = jnp.concatenate(
        [jnp.zeros((g, s), jnp.float32), new,
         jnp.zeros((g, mtot - s - mp), jnp.float32)], axis=1)         # zero halo/ring
    return jnp.concatenate([feats, new_pf], axis=0)                   # channel concat


def _stem_kernel(a_ref, w_ref, place_ref, mask_ref, o_ref, *, mp, wp):
    """conv0 + norm0 + relu0 + maxpool0, fused; emits block-1's padded-flat slab.

    a_ref:     (147, 4*n*h*w) bf16 im2col, columns parity-major (p, q, n, h//2, w//2)
    w_ref:     (16, 147) bf16 (norm0 folded)
    place_ref: (n*h*w, Mtot1) bf16 0/1 placement into padded-flat layout
    mask_ref:  (1, mp) f32 interior mask
    o_ref:     (16, Mtot1) bf16
    """
    s = wp + 1
    mtot = o_ref.shape[1]
    cout = o_ref.shape[0]
    y = jnp.maximum(jnp.dot(w_ref[...], a_ref[...],
                            preferred_element_type=jnp.float32), 0.0)   # conv0+relu0
    md = place_ref.shape[0]
    # scatter each conv-output parity slab into the padded-flat geometry
    z00, z01, z10, z11 = [
        jnp.dot(y[:, p * md:(p + 1) * md].astype(jnp.bfloat16), place_ref[...],
                preferred_element_type=jnp.float32) for p in range(4)]
    # maxpool 3x3/s2/p1 = max over 9 lane-shifted reads of the 4 parity slabs.
    # Zero ring stands in for -inf padding, valid because inputs are post-ReLU >= 0.
    taps = (z00[:, s:s + mp],
            z01[:, s:s + mp], z01[:, s - 1:s - 1 + mp],
            z10[:, s:s + mp], z10[:, s - wp:s - wp + mp],
            z11[:, s:s + mp], z11[:, s - 1:s - 1 + mp],
            z11[:, s - wp:s - wp + mp], z11[:, s - wp - 1:s - wp - 1 + mp])
    pooled = functools.reduce(jnp.maximum, taps) * mask_ref[...]
    o_ref[...] = jnp.concatenate(
        [jnp.zeros((cout, s), jnp.float32), pooled,
         jnp.zeros((cout, mtot - s - mp), jnp.float32)],
        axis=1).astype(o_ref.dtype)                                      # single store


def _block_transition_kernel(*refs, num_layers, mp, wp):
    """Whole dense block (all layers, concat in VMEM) + fused Transition epilogue."""
    x_ref, mask_ref = refs[0], refs[1]
    lrefs = refs[2:2 + 2 * num_layers]
    p2_ref, wt_ref, o_ref = refs[2 + 2 * num_layers:]
    mask = mask_ref[...]
    feats = x_ref[...].astype(jnp.float32)
    for li in range(num_layers):
        feats = _dense_layer_step(feats, mask, lrefs[2 * li][...],
                                  lrefs[2 * li + 1][...], mp, wp)
    # Transition: norm(folded)+relu -> (avgpool 2x2/s2 & 1x1 conv commuted); the pool
    # matrix also repacks directly into the NEXT block's padded-flat layout.
    tr = jnp.maximum(feats, 0.0).astype(jnp.bfloat16)
    pooled = jnp.dot(tr, p2_ref[...], preferred_element_type=jnp.float32)
    out = jnp.dot(wt_ref[...], pooled.astype(jnp.bfloat16),
                  preferred_element_type=jnp.float32)
    o_ref[...] = out.astype(o_ref.dtype)


def _block_head_kernel(*refs, num_layers, mp, wp):
    """Whole dense block + fused head (norm5+relu+global avg pool+classifier)."""
    x_ref, mask_ref = refs[0], refs[1]
    lrefs = refs[2:2 + 2 * num_layers]
    gap_ref, wfc_ref, b_ref, o_ref = refs[2 + 2 * num_layers:]
    mask = mask_ref[...]
    feats = x_ref[...].astype(jnp.float32)
    for li in range(num_layers):
        feats = _dense_layer_step(feats, mask, lrefs[2 * li][...],
                                  lrefs[2 * li + 1][...], mp, wp)
    hr = jnp.maximum(feats, 0.0)                                          # relu (norm5 folded)
    pooled = jnp.dot(hr, gap_ref[...], preferred_element_type=jnp.float32)    # (C, N)
    o_ref[...] = (jnp.dot(wfc_ref[...], pooled, preferred_element_type=jnp.float32)
                  + b_ref[...])                                           # (classes, N)


# ---------------- Pallas wrappers ----------------
def stem(a, w0fold, place, mask, geom):
    return pl.pallas_call(
        functools.partial(_stem_kernel, mp=geom["mp"], wp=geom["wp"]),
        out_shape=jax.ShapeDtypeStruct((w0fold.shape[0], geom["mtot"]), jnp.bfloat16),
        in_specs=[_VMEM] * 4,
        out_specs=_VMEM,
    )(a, w0fold, place, mask)


def dense_block_transition(x_pf, mask, layer_ws, p2, wt, geom_in, geom_out):
    return pl.pallas_call(
        functools.partial(_block_transition_kernel, num_layers=len(layer_ws) // 2,
                          mp=geom_in["mp"], wp=geom_in["wp"]),
        out_shape=jax.ShapeDtypeStruct((wt.shape[0], geom_out["mtot"]), jnp.bfloat16),
        in_specs=[_VMEM] * (4 + len(layer_ws)),
        out_specs=_VMEM,
    )(x_pf, mask, *layer_ws, p2, wt)


def dense_block_head(x_pf, mask, layer_ws, gap, wfc, bfc, geom):
    n = gap.shape[1]
    return pl.pallas_call(
        functools.partial(_block_head_kernel, num_layers=len(layer_ws) // 2,
                          mp=geom["mp"], wp=geom["wp"]),
        out_shape=jax.ShapeDtypeStruct((wfc.shape[0], n), jnp.float32),
        in_specs=[_VMEM] * (5 + len(layer_ws)),
        out_specs=_VMEM,
    )(x_pf, mask, *layer_ws, gap, wfc, bfc)


def _conv0_im2col(x_nchw):
    """7x7/s2/p3 im2col; output columns parity-major so the maxpool is lane shifts."""
    n = x_nchw.shape[0]
    x = jnp.transpose(x_nchw, (1, 0, 2, 3)).astype(jnp.bfloat16)        # (C, N, H, W)
    c, _, hh, ww = x.shape
    ho, wo = (hh + 6 - 7) // 2 + 1, (ww + 6 - 7) // 2 + 1
    assert ho % 2 == 0 and wo % 2 == 0
    xp = jnp.pad(x, ((0, 0), (0, 0), (3, 3), (3, 3)))
    taps = [xp[:, :, di:di + 2 * ho:2, dj:dj + 2 * wo:2]
            for di in range(7) for dj in range(7)]
    a = jnp.concatenate(taps, axis=0)                                   # (49C, N, Ho, Wo)
    a = a.reshape(49 * c, n, ho // 2, 2, wo // 2, 2)
    a = jnp.transpose(a, (0, 3, 5, 1, 2, 4)).reshape(49 * c, n * ho * wo)
    return a, ho, wo


# ---------------- parameter init (matches module __init__ shapes) ----------------
def _kaiming_conv(key, cout, cin, kh, kw):
    std = math.sqrt(2.0 / (cin * kh * kw))    # nn.init.kaiming_normal_ (fan_in, relu)
    return jax.random.normal(key, (cout, cin, kh, kw), jnp.float32) * std


def init_params(key):
    params = {}
    keys = iter(jax.random.split(key, 64))
    params["conv0_w"] = _kaiming_conv(next(keys), NUM_INIT, 3, 7, 7)
    num_features = NUM_INIT
    for bi, num_layers in enumerate(BLOCK_CONFIG):
        for li in range(num_layers):
            in_feats = num_features + li * GROWTH
            params[f"b{bi}_l{li}_conv1_w"] = _kaiming_conv(
                next(keys), BN_SIZE * GROWTH, in_feats, 1, 1)
            params[f"b{bi}_l{li}_conv2_w"] = _kaiming_conv(
                next(keys), GROWTH, BN_SIZE * GROWTH, 3, 3)
        num_features += num_layers * GROWTH
        if bi != len(BLOCK_CONFIG) - 1:
            params[f"trans{bi}_conv_w"] = _kaiming_conv(
                next(keys), num_features // 2, num_features, 1, 1)
            num_features //= 2
    # nn.Linear default weight init: kaiming_uniform_(a=sqrt(5)) -> U(-1/sqrt(fan_in), .)
    bound = 1.0 / math.sqrt(num_features)
    params["fc_w"] = jax.random.uniform(
        next(keys), (NUM_CLASSES, num_features), jnp.float32, -bound, bound)
    params["fc_b"] = jnp.zeros((NUM_CLASSES,), jnp.float32)   # nn.init.constant_(bias, 0)
    return params


# ---------------- forward pass (3 pallas_call launches total) ----------------
def densenet_forward(params, x_nchw):
    n = x_nchw.shape[0]

    # stem: conv0 + norm0 + relu0 + maxpool0 -> block-1 padded-flat slab
    a, ho, wo = _conv0_im2col(x_nchw)
    geom = _geom(n, ho // 2, wo // 2)
    mask = _interior_mask(geom)
    place = _place_matrix(geom)
    w0 = (jnp.transpose(params["conv0_w"], (0, 2, 3, 1)).reshape(NUM_INIT, -1)
          * BN_SCALE).astype(jnp.bfloat16)
    x = stem(a, w0, place, mask, geom)                      # (16, Mtot1) bf16

    num_features = NUM_INIT
    last = len(BLOCK_CONFIG) - 1
    logits = None
    for bi, num_layers in enumerate(BLOCK_CONFIG):
        layer_ws = []
        for li in range(num_layers):
            cin = num_features + li * GROWTH
            w1f = (params[f"b{bi}_l{li}_conv1_w"].reshape(BN_SIZE * GROWTH, cin)
                   * BN_SCALE).astype(jnp.bfloat16)
            w2f = (jnp.transpose(params[f"b{bi}_l{li}_conv2_w"], (0, 2, 3, 1))
                   .reshape(GROWTH, 9 * BN_SIZE * GROWTH)
                   * BN_SCALE).astype(jnp.bfloat16)
            layer_ws += [w1f, w2f]
        num_features += num_layers * GROWTH

        if bi != last:                                      # block + fused Transition
            assert geom["h"] % 2 == 0 and geom["w"] % 2 == 0
            geom_out = _geom(n, geom["h"] // 2, geom["w"] // 2)
            p2 = _pool_matrix(geom, geom_out)
            wt = (params[f"trans{bi}_conv_w"]
                  .reshape(num_features // 2, num_features)
                  * BN_SCALE).astype(jnp.bfloat16)
            x = dense_block_transition(x, mask, layer_ws, p2, wt, geom, geom_out)
            num_features //= 2
            geom = geom_out
            mask = _interior_mask(geom)
        else:                                               # block + fused head
            gap = _gap_matrix(geom)
            wfc = params["fc_w"] * BN_SCALE                 # norm5 folded (f32)
            bfc = params["fc_b"].reshape(NUM_CLASSES, 1)
            logits = dense_block_head(x, mask, layer_ws, gap, wfc, bfc, geom)
    return logits.T                                         # (N, classes)


if __name__ == "__main__":
    key = jax.random.PRNGKey(0)
    pkey, xkey = jax.random.split(key)
    params = init_params(pkey)
    x = jax.random.normal(xkey, (2, 3, 32, 32), jnp.float32)   # NCHW, like PyTorch
    out = jax.jit(densenet_forward)(params, x)
    jax.block_until_ready(out)
    assert out.shape == (2, NUM_CLASSES) and out.dtype == jnp.float32
    print("KERNEL_OK")
</pallas_src>

<mosaic_0001>
module attributes {stable_mosaic.version = 11 : i64} {
  func.func @_stem_kernel(%arg0: memref<147x512xbf16, #tpu.memory_space<vmem>>, %arg1: memref<16x147xbf16, #tpu.memory_space<vmem>>, %arg2: memref<128x256xbf16, #tpu.memory_space<vmem>>, %arg3: memref<1x200xf32, #tpu.memory_space<vmem>>, %arg4: memref<16x256xbf16, #tpu.memory_space<vmem>>) attributes {dimension_semantics = [], scalar_prefetch = 0 : i64, scratch_operands = 0 : i64, tpu.core_type = #tpu.core_type<tc>} {
    %c0 = arith.constant 0 : index
    %c0_0 = arith.constant 0 : index
    %0 = vector.load %arg1[%c0, %c0_0] : memref<16x147xbf16, #tpu.memory_space<vmem>>, vector<16x147xbf16>
    %c0_1 = arith.constant 0 : index
    %c0_2 = arith.constant 0 : index
    %1 = vector.load %arg0[%c0_1, %c0_2] : memref<147x512xbf16, #tpu.memory_space<vmem>>, vector<147x512xbf16>
    %cst = arith.constant dense<0.000000e+00> : vector<16x512xf32>
    %2 = tpu.matmul %0, %1, %cst {dimension_numbers = #tpu.dot_dimension_numbers<[1], [0], [0], [1], [0, 0, 1, 1], [], []>} : vector<16x147xbf16>, vector<147x512xbf16>, vector<16x512xf32> -> vector<16x512xf32>
    %cst_3 = arith.constant 0.000000e+00 : f32
    %3 = vector.broadcast %cst_3 : f32 to vector<16x512xf32>
    %4 = arith.maximumf %2, %3 : vector<16x512xf32>
    %5 = vector.extract_strided_slice %4 {offsets = [0, 0], sizes = [16, 128], strides = [1, 1]} : vector<16x512xf32> to vector<16x128xf32>
    %6 = arith.truncf %5 : vector<16x128xf32> to vector<16x128xbf16>
    %c0_4 = arith.constant 0 : index
    %c0_5 = arith.constant 0 : index
    %7 = vector.load %arg2[%c0_4, %c0_5] : memref<128x256xbf16, #tpu.memory_space<vmem>>, vector<128x256xbf16>
    %cst_6 = arith.constant dense<0.000000e+00> : vector<16x256xf32>
    %8 = tpu.matmul %6, %7, %cst_6 {dimension_numbers = #tpu.dot_dimension_numbers<[1], [0], [0], [1], [0, 0, 1, 1], [], []>} : vector<16x128xbf16>, vector<128x256xbf16>, vector<16x256xf32> -> vector<16x256xf32>
    %9 = vector.extract_strided_slice %4 {offsets = [0, 128], sizes = [16, 128], strides = [1, 1]} : vector<16x512xf32> to vector<16x128xf32>
    %10 = arith.truncf %9 : vector<16x128xf32> to vector<16x128xbf16>
    %c0_7 = arith.constant 0 : index
    %c0_8 = arith.constant 0 : index
    %11 = vector.load %arg2[%c0_7, %c0_8] : memref<128x256xbf16, #tpu.memory_space<vmem>>, vector<128x256xbf16>
    %cst_9 = arith.constant dense<0.000000e+00> : vector<16x256xf32>
    %12 = tpu.matmul %10, %11, %cst_9 {dimension_numbers = #tpu.dot_dimension_numbers<[1], [0], [0], [1], [0, 0, 1, 1], [], []>} : vector<16x128xbf16>, vector<128x256xbf16>, vector<16x256xf32> -> vector<16x256xf32>
    %13 = vector.extract_strided_slice %4 {offsets = [0, 256], sizes = [16, 128], strides = [1, 1]} : vector<16x512xf32> to vector<16x128xf32>
    %14 = arith.truncf %13 : vector<16x128xf32> to vector<16x128xbf16>
    %c0_10 = arith.constant 0 : index
    %c0_11 = arith.constant 0 : index
    %15 = vector.load %arg2[%c0_10, %c0_11] : memref<128x256xbf16, #tpu.memory_space<vmem>>, vector<128x256xbf16>
    %cst_12 = arith.constant dense<0.000000e+00> : vector<16x256xf32>
    %16 = tpu.matmul %14, %15, %cst_12 {dimension_numbers = #tpu.dot_dimension_numbers<[1], [0], [0], [1], [0, 0, 1, 1], [], []>} : vector<16x128xbf16>, vector<128x256xbf16>, vector<16x256xf32> -> vector<16x256xf32>
    %17 = vector.extract_strided_slice %4 {offsets = [0, 384], sizes = [16, 128], strides = [1, 1]} : vector<16x512xf32> to vector<16x128xf32>
    %18 = arith.truncf %17 : vector<16x128xf32> to vector<16x128xbf16>
    %c0_13 = arith.constant 0 : index
    %c0_14 = arith.constant 0 : index
    %19 = vector.load %arg2[%c0_13, %c0_14] : memref<128x256xbf16, #tpu.memory_space<vmem>>, vector<128x256xbf16>
    %cst_15 = arith.constant dense<0.000000e+00> : vector<16x256xf32>
    %20 = tpu.matmul %18, %19, %cst_15 {dimension_numbers = #tpu.dot_dimension_numbers<[1], [0], [0], [1], [0, 0, 1, 1], [], []>} : vector<16x128xbf16>, vector<128x256xbf16>, vector<16x256xf32> -> vector<16x256xf32>
    %21 = vector.extract_strided_slice %8 {offsets = [0, 11], sizes = [16, 200], strides = [1, 1]} : vector<16x256xf32> to vector<16x200xf32>
    %22 = vector.extract_strided_slice %12 {offsets = [0, 11], sizes = [16, 200], strides = [1, 1]} : vector<16x256xf32> to vector<16x200xf32>
    %23 = vector.extract_strided_slice %12 {offsets = [0, 10], sizes = [16, 200], strides = [1, 1]} : vector<16x256xf32> to vector<16x200xf32>
    %24 = vector.extract_strided_slice %16 {offsets = [0, 11], sizes = [16, 200], strides = [1, 1]} : vector<16x256xf32> to vector<16x200xf32>
    %25 = vector.extract_strided_slice %16 {offsets = [0, 1], sizes = [16, 200], strides = [1, 1]} : vector<16x256xf32> to vector<16x200xf32>
    %26 = vector.extract_strided_slice %20 {offsets = [0, 11], sizes = [16, 200], strides = [1, 1]} : vector<16x256xf32> to vector<16x200xf32>
    %27 = vector.extract_strided_slice %20 {offsets = [0, 10], sizes = [16, 200], strides = [1, 1]} : vector<16x256xf32> to vector<16x200xf32>
    %28 = vector.extract_strided_slice %20 {offsets = [0, 1], sizes = [16, 200], strides = [1, 1]} : vector<16x256xf32> to vector<16x200xf32>
    %29 = vector.extract_strided_slice %20 {offsets = [0, 0], sizes = [16, 200], strides = [1, 1]} : vector<16x256xf32> to vector<16x200xf32>
    %30 = arith.maximumf %21, %22 : vector<16x200xf32>
    %31 = arith.maximumf %30, %23 : vector<16x200xf32>
    %32 = arith.maximumf %31, %24 : vector<16x200xf32>
    %33 = arith.maximumf %32, %25 : vector<16x200xf32>
    %34 = arith.maximumf %33, %26 : vector<16x200xf32>
    %35 = arith.maximumf %34, %27 : vector<16x200xf32>
    %36 = arith.maximumf %35, %28 : vector<16x200xf32>
    %37 = arith.maximumf %36, %29 : vector<16x200xf32>
    %c0_16 = arith.constant 0 : index
    %c0_17 = arith.constant 0 : index
    %38 = vector.load %arg3[%c0_16, %c0_17] : memref<1x200xf32, #tpu.memory_space<vmem>>, vector<1x200xf32>
    %39 = vector.broadcast %38 : vector<1x200xf32> to vector<16x200xf32>
    %40 = arith.mulf %37, %39 : vector<16x200xf32>
    %cst_18 = arith.constant 0.000000e+00 : f32
    %41 = vector.broadcast %cst_18 : f32 to vector<16x11xf32>
    %cst_19 = arith.constant 0.000000e+00 : f32
    %42 = vector.broadcast %cst_19 : f32 to vector<16x45xf32>
    %43 = tpu.concatenate %41, %40, %42 in 1 : vector<16x11xf32>, vector<16x200xf32>, vector<16x45xf32> -> vector<16x256xf32>
    %44 = arith.truncf %43 : vector<16x256xf32> to vector<16x256xbf16>
    %c0_20 = arith.constant 0 : index
    %c0_21 = arith.constant 0 : index
    %45 = vector.load %arg4[%c0_20, %c0_21] : memref<16x256xbf16, #tpu.memory_space<vmem>>, vector<16x256xbf16>
    tpu.vector_store %arg4[%c0_20, %c0_21], %44 {strides = array<i32>} : memref<16x256xbf16, #tpu.memory_space<vmem>>, vector<16x256xbf16>,
    return
  }
}

module attributes {stable_mosaic.version = 11 : i64} {
  func.func @_block_transition_kernel(%arg0: memref<16x256xbf16, #tpu.memory_space<vmem>>, %arg1: memref<1x200xf32, #tpu.memory_space<vmem>>, %arg2: memref<16x16xbf16, #tpu.memory_space<vmem>>, %arg3: memref<8x144xbf16, #tpu.memory_space<vmem>>, %arg4: memref<16x24xbf16, #tpu.memory_space<vmem>>, %arg5: memref<8x144xbf16, #tpu.memory_space<vmem>>, %arg6: memref<256x128xbf16, #tpu.memory_space<vmem>>, %arg7: memref<16x32xbf16, #tpu.memory_space<vmem>>, %arg8: memref<16x128xbf16, #tpu.memory_space<vmem>>) attributes {dimension_semantics = [], scalar_prefetch = 0 : i64, scratch_operands = 0 : i64, tpu.core_type = #tpu.core_type<tc>} {
    %c0 = arith.constant 0 : index
    %c0_0 = arith.constant 0 : index
    %0 = vector.load %arg1[%c0, %c0_0] : memref<1x200xf32, #tpu.memory_space<vmem>>, vector<1x200xf32>
    %c0_1 = arith.constant 0 : index
    %c0_2 = arith.constant 0 : index
    %1 = vector.load %arg0[%c0_1, %c0_2] : memref<16x256xbf16, #tpu.memory_space<vmem>>, vector<16x256xbf16>
    %2 = arith.extf %1 : vector<16x256xbf16> to vector<16x256xf32>
    %c0_3 = arith.constant 0 : index
    %c0_4 = arith.constant 0 : index
    %3 = vector.load %arg2[%c0_3, %c0_4] : memref<16x16xbf16, #tpu.memory_space<vmem>>, vector<16x16xbf16>
    %c0_5 = arith.constant 0 : index
    %c0_6 = arith.constant 0 : index
    %4 = vector.load %arg3[%c0_5, %c0_6] : memref<8x144xbf16, #tpu.memory_space<vmem>>, vector<8x144xbf16>
    %cst = arith.constant 0.000000e+00 : f32
    %5 = vector.broadcast %cst : f32 to vector<16x256xf32>
    %6 = arith.maximumf %2, %5 : vector<16x256xf32>
    %7 = arith.truncf %6 : vector<16x256xf32> to vector<16x256xbf16>
    %cst_7 = arith.constant dense<0.000000e+00> : vector<16x256xf32>
    %8 = tpu.matmul %3, %7, %cst_7 {dimension_numbers = #tpu.dot_dimension_numbers<[1], [0], [0], [1], [0, 0, 1, 1], [], []>} : vector<16x16xbf16>, vector<16x256xbf16>, vector<16x256xf32> -> vector<16x256xf32>
    %cst_8 = arith.constant 0.000000e+00 : f32
    %9 = vector.broadcast %cst_8 : f32 to vector<16x256xf32>
    %10 = arith.maximumf %8, %9 : vector<16x256xf32>
    %11 = arith.truncf %10 : vector<16x256xf32> to vector<16x256xbf16>
    %12 = vector.extract_strided_slice %11 {offsets = [0, 0], sizes = [16, 200], strides = [1, 1]} : vector<16x256xbf16> to vector<16x200xbf16>
    %13 = vector.extract_strided_slice %11 {offsets = [0, 1], sizes = [16, 200], strides = [1, 1]} : vector<16x256xbf16> to vector<16x200xbf16>
    %14 = vector.extract_strided_slice %11 {offsets = [0, 2], sizes = [16, 200], strides = [1, 1]} : vector<16x256xbf16> to vector<16x200xbf16>
    %15 = vector.extract_strided_slice %11 {offsets = [0, 10], sizes = [16, 200], strides = [1, 1]} : vector<16x256xbf16> to vector<16x200xbf16>
    %16 = vector.extract_strided_slice %11 {offsets = [0, 11], sizes = [16, 200], strides = [1, 1]} : vector<16x256xbf16> to vector<16x200xbf16>
    %17 = vector.extract_strided_slice %11 {offsets = [0, 12], sizes = [16, 200], strides = [1, 1]} : vector<16x256xbf16> to vector<16x200xbf16>
    %18 = vector.extract_strided_slice %11 {offsets = [0, 20], sizes = [16, 200], strides = [1, 1]} : vector<16x256xbf16> to vector<16x200xbf16>
    %19 = vector.extract_strided_slice %11 {offsets = [0, 21], sizes = [16, 200], strides = [1, 1]} : vector<16x256xbf16> to vector<16x200xbf16>
    %20 = vector.extract_strided_slice %11 {offsets = [0, 22], sizes = [16, 200], strides = [1, 1]} : vector<16x256xbf16> to vector<16x200xbf16>
    %21 = tpu.concatenate %12, %13, %14, %15, %16, %17, %18, %19, %20 in 0 : vector<16x200xbf16>, vector<16x200xbf16>, vector<16x200xbf16>, vector<16x200xbf16>, vector<16x200xbf16>, vector<16x200xbf16>, vector<16x200xbf16>, vector<16x200xbf16>, vector<16x200xbf16> -> vector<144x200xbf16>
    %cst_9 = arith.constant dense<0.000000e+00> : vector<8x200xf32>
    %22 = tpu.matmul %4, %21, %cst_9 {dimension_numbers = #tpu.dot_dimension_numbers<[1], [0], [0], [1], [0, 0, 1, 1], [], []>} : vector<8x144xbf16>, vector<144x200xbf16>, vector<8x200xf32> -> vector<8x200xf32>
    %23 = vector.broadcast %0 : vector<1x200xf32> to vector<8x200xf32>
    %24 = arith.mulf %22, %23 : vector<8x200xf32>
    %cst_10 = arith.constant 0.000000e+00 : f32
    %25 = vector.broadcast %cst_10 : f32 to vector<8x11xf32>
    %cst_11 = arith.constant 0.000000e+00 : f32
    %26 = vector.broadcast %cst_11 : f32 to vector<8x45xf32>
    %27 = tpu.concatenate %25, %24, %26 in 1 : vector<8x11xf32>, vector<8x200xf32>, vector<8x45xf32> -> vector<8x256xf32>
    %28 = tpu.concatenate %2, %27 in 0 : vector<16x256xf32>, vector<8x256xf32> -> vector<24x256xf32>
    %c0_12 = arith.constant 0 : index
    %c0_13 = arith.constant 0 : index
    %29 = vector.load %arg4[%c0_12, %c0_13] : memref<16x24xbf16, #tpu.memory_space<vmem>>, vector<16x24xbf16>
    %c0_14 = arith.constant 0 : index
    %c0_15 = arith.constant 0 : index
    %30 = vector.load %arg5[%c0_14, %c0_15] : memref<8x144xbf16, #tpu.memory_space<vmem>>, vector<8x144xbf16>
    %cst_16 = arith.constant 0.000000e+00 : f32
    %31 = vector.broadcast %cst_16 : f32 to vector<24x256xf32>
    %32 = arith.maximumf %28, %31 : vector<24x256xf32>
    %33 = arith.truncf %32 : vector<24x256xf32> to vector<24x256xbf16>
    %cst_17 = arith.constant dense<0.000000e+00> : vector<16x256xf32>
    %34 = tpu.matmul %29, %33, %cst_17 {dimension_numbers = #tpu.dot_dimension_numbers<[1], [0], [0], [1], [0, 0, 1, 1], [], []>} : vector<16x24xbf16>, vector<24x256xbf16>, vector<16x256xf32> -> vector<16x256xf32>
    %cst_18 = arith.constant 0.000000e+00 : f32
    %35 = vector.broadcast %cst_18 : f32 to vector<16x256xf32>
    %36 = arith.maximumf %34, %35 : vector<16x256xf32>
    %37 = arith.truncf %36 : vector<16x256xf32> to vector<16x256xbf16>
    %38 = vector.extract_strided_slice %37 {offsets = [0, 0], sizes = [16, 200], strides = [1, 1]} : vector<16x256xbf16> to vector<16x200xbf16>
    %39 = vector.extract_strided_slice %37 {offsets = [0, 1], sizes = [16, 200], strides = [1, 1]} : vector<16x256xbf16> to vector<16x200xbf16>
    %40 = vector.extract_strided_slice %37 {offsets = [0, 2], sizes = [16, 200], strides = [1, 1]} : vector<16x256xbf16> to vector<16x200xbf16>
    %41 = vector.extract_strided_slice %37 {offsets = [0, 10], sizes = [16, 200], strides = [1, 1]} : vector<16x256xbf16> to vector<16x200xbf16>
    %42 = vector.extract_strided_slice %37 {offsets = [0, 11], sizes = [16, 200], strides = [1, 1]} : vector<16x256xbf16> to vector<16x200xbf16>
    %43 = vector.extract_strided_slice %37 {offsets = [0, 12], sizes = [16, 200], strides = [1, 1]} : vector<16x256xbf16> to vector<16x200xbf16>
    %44 = vector.extract_strided_slice %37 {offsets = [0, 20], sizes = [16, 200], strides = [1, 1]} : vector<16x256xbf16> to vector<16x200xbf16>
    %45 = vector.extract_strided_slice %37 {offsets = [0, 21], sizes = [16, 200], strides = [1, 1]} : vector<16x256xbf16> to vector<16x200xbf16>
    %46 = vector.extract_strided_slice %37 {offsets = [0, 22], sizes = [16, 200], strides = [1, 1]} : vector<16x256xbf16> to vector<16x200xbf16>
    %47 = tpu.concatenate %38, %39, %40, %41, %42, %43, %44, %45, %46 in 0 : vector<16x200xbf16>, vector<16x200xbf16>, vector<16x200xbf16>, vector<16x200xbf16>, vector<16x200xbf16>, vector<16x200xbf16>, vector<16x200xbf16>, vector<16x200xbf16>, vector<16x200xbf16> -> vector<144x200xbf16>
    %cst_19 = arith.constant dense<0.000000e+00> : vector<8x200xf32>
    %48 = tpu.matmul %30, %47, %cst_19 {dimension_numbers = #tpu.dot_dimension_numbers<[1], [0], [0], [1], [0, 0, 1, 1], [], []>} : vector<8x144xbf16>, vector<144x200xbf16>, vector<8x200xf32> -> vector<8x200xf32>
    %49 = vector.broadcast %0 : vector<1x200xf32> to vector<8x200xf32>
    %50 = arith.mulf %48, %49 : vector<8x200xf32>
    %cst_20 = arith.constant 0.000000e+00 : f32
    %51 = vector.broadcast %cst_20 : f32 to vector<8x11xf32>
    %cst_21 = arith.constant 0.000000e+00 : f32
    %52 = vector.broadcast %cst_21 : f32 to vector<8x45xf32>
    %53 = tpu.concatenate %51, %50, %52 in 1 : vector<8x11xf32>, vector<8x200xf32>, vector<8x45xf32> -> vector<8x256xf32>
    %54 = tpu.concatenate %28, %53 in 0 : vector<24x256xf32>, vector<8x256xf32> -> vector<32x256xf32>
    %cst_22 = arith.constant 0.000000e+00 : f32
    %55 = vector.broadcast %cst_22 : f32 to vector<32x256xf32>
    %56 = arith.maximumf %54, %55 : vector<32x256xf32>
    %57 = arith.truncf %56 : vector<32x256xf32> to vector<32x256xbf16>
    %c0_23 = arith.constant 0 : index
    %c0_24 = arith.constant 0 : index
    %58 = vector.load %arg6[%c0_23, %c0_24] : memref<256x128xbf16, #tpu.memory_space<vmem>>, vector<256x128xbf16>
    %cst_25 = arith.constant dense<0.000000e+00> : vector<32x128xf32>
    %59 = tpu.matmul %57, %58, %cst_25 {dimension_numbers = #tpu.dot_dimension_numbers<[1], [0], [0], [1], [0, 0, 1, 1], [], []>} : vector<32x256xbf16>, vector<256x128xbf16>, vector<32x128xf32> -> vector<32x128xf32>
    %c0_26 = arith.constant 0 : index
    %c0_27 = arith.constant 0 : index
    %60 = vector.load %arg7[%c0_26, %c0_27] : memref<16x32xbf16, #tpu.memory_space<vmem>>, vector<16x32xbf16>
    %61 = arith.truncf %59 : vector<32x128xf32> to vector<32x128xbf16>
    %cst_28 = arith.constant dense<0.000000e+00> : vector<16x128xf32>
    %62 = tpu.matmul %60, %61, %cst_28 {dimension_numbers = #tpu.dot_dimension_numbers<[1], [0], [0], [1], [0, 0, 1, 1], [], []>} : vector<16x32xbf16>, vector<32x128xbf16>, vector<16x128xf32> -> vector<16x128xf32>
    %63 = arith.truncf %62 : vector<16x128xf32> to vector<16x128xbf16>
    %c0_29 = arith.constant 0 : index
    %c0_30 = arith.constant 0 : index
    %64 = vector.load %arg8[%c0_29, %c0_30] : memref<16x128xbf16, #tpu.memory_space<vmem>>, vector<16x128xbf16>
    tpu.vector_store %arg8[%c0_29, %c0_30], %63 {strides = array<i32>} : memref<16x128xbf16, #tpu.memory_space<vmem>>, vector<16x128xbf16>,
    return
  }
}

module attributes {stable_mosaic.version = 11 : i64} {
  func.func @_block_head_kernel(%arg0: memref<16x128xbf16, #tpu.memory_space<vmem>>, %arg1: memref<1x72xf32, #tpu.memory_space<vmem>>, %arg2: memref<16x16xbf16, #tpu.memory_space<vmem>>, %arg3: memref<8x144xbf16, #tpu.memory_space<vmem>>, %arg4: memref<16x24xbf16, #tpu.memory_space<vmem>>, %arg5: memref<8x144xbf16, #tpu.memory_space<vmem>>, %arg6: memref<128x2xf32, #tpu.memory_space<vmem>>, %arg7: memref<10x32xf32, #tpu.memory_space<vmem>>, %arg8: memref<10x1xf32, #tpu.memory_space<vmem>>, %arg9: memref<10x2xf32, #tpu.memory_space<vmem>>) attributes {dimension_semantics = [], scalar_prefetch = 0 : i64, scratch_operands = 0 : i64, tpu.core_type = #tpu.core_type<tc>} {
    %c0 = arith.constant 0 : index
    %c0_0 = arith.constant 0 : index
    %0 = vector.load %arg1[%c0, %c0_0] : memref<1x72xf32, #tpu.memory_space<vmem>>, vector<1x72xf32>
    %c0_1 = arith.constant 0 : index
    %c0_2 = arith.constant 0 : index
    %1 = vector.load %arg0[%c0_1, %c0_2] : memref<16x128xbf16, #tpu.memory_space<vmem>>, vector<16x128xbf16>
    %2 = arith.extf %1 : vector<16x128xbf16> to vector<16x128xf32>
    %c0_3 = arith.constant 0 : index
    %c0_4 = arith.constant 0 : index
    %3 = vector.load %arg2[%c0_3, %c0_4] : memref<16x16xbf16, #tpu.memory_space<vmem>>, vector<16x16xbf16>
    %c0_5 = arith.constant 0 : index
    %c0_6 = arith.constant 0 : index
    %4 = vector.load %arg3[%c0_5, %c0_6] : memref<8x144xbf16, #tpu.memory_space<vmem>>, vector<8x144xbf16>
    %cst = arith.constant 0.000000e+00 : f32
    %5 = vector.broadcast %cst : f32 to vector<16x128xf32>
    %6 = arith.maximumf %2, %5 : vector<16x128xf32>
    %7 = arith.truncf %6 : vector<16x128xf32> to vector<16x128xbf16>
    %cst_7 = arith.constant dense<0.000000e+00> : vector<16x128xf32>
    %8 = tpu.matmul %3, %7, %cst_7 {dimension_numbers = #tpu.dot_dimension_numbers<[1], [0], [0], [1], [0, 0, 1, 1], [], []>} : vector<16x16xbf16>, vector<16x128xbf16>, vector<16x128xf32> -> vector<16x128xf32>
    %cst_8 = arith.constant 0.000000e+00 : f32
    %9 = vector.broadcast %cst_8 : f32 to vector<16x128xf32>
    %10 = arith.maximumf %8, %9 : vector<16x128xf32>
    %11 = arith.truncf %10 : vector<16x128xf32> to vector<16x128xbf16>
    %12 = vector.extract_strided_slice %11 {offsets = [0, 0], sizes = [16, 72], strides = [1, 1]} : vector<16x128xbf16> to vector<16x72xbf16>
    %13 = vector.extract_strided_slice %11 {offsets = [0, 1], sizes = [16, 72], strides = [1, 1]} : vector<16x128xbf16> to vector<16x72xbf16>
    %14 = vector.extract_strided_slice %11 {offsets = [0, 2], sizes = [16, 72], strides = [1, 1]} : vector<16x128xbf16> to vector<16x72xbf16>
    %15 = vector.extract_strided_slice %11 {offsets = [0, 6], sizes = [16, 72], strides = [1, 1]} : vector<16x128xbf16> to vector<16x72xbf16>
    %16 = vector.extract_strided_slice %11 {offsets = [0, 7], sizes = [16, 72], strides = [1, 1]} : vector<16x128xbf16> to vector<16x72xbf16>
    %17 = vector.extract_strided_slice %11 {offsets = [0, 8], sizes = [16, 72], strides = [1, 1]} : vector<16x128xbf16> to vector<16x72xbf16>
    %18 = vector.extract_strided_slice %11 {offsets = [0, 12], sizes = [16, 72], strides = [1, 1]} : vector<16x128xbf16> to vector<16x72xbf16>
    %19 = vector.extract_strided_slice %11 {offsets = [0, 13], sizes = [16, 72], strides = [1, 1]} : vector<16x128xbf16> to vector<16x72xbf16>
    %20 = vector.extract_strided_slice %11 {offsets = [0, 14], sizes = [16, 72], strides = [1, 1]} : vector<16x128xbf16> to vector<16x72xbf16>
    %21 = tpu.concatenate %12, %13, %14, %15, %16, %17, %18, %19, %20 in 0 : vector<16x72xbf16>, vector<16x72xbf16>, vector<16x72xbf16>, vector<16x72xbf16>, vector<16x72xbf16>, vector<16x72xbf16>, vector<16x72xbf16>, vector<16x72xbf16>, vector<16x72xbf16> -> vector<144x72xbf16>
    %cst_9 = arith.constant dense<0.000000e+00> : vector<8x72xf32>
    %22 = tpu.matmul %4, %21, %cst_9 {dimension_numbers = #tpu.dot_dimension_numbers<[1], [0], [0], [1], [0, 0, 1, 1], [], []>} : vector<8x144xbf16>, vector<144x72xbf16>, vector<8x72xf32> -> vector<8x72xf32>
    %23 = vector.broadcast %0 : vector<1x72xf32> to vector<8x72xf32>
    %24 = arith.mulf %22, %23 : vector<8x72xf32>
    %cst_10 = arith.constant 0.000000e+00 : f32
    %25 = vector.broadcast %cst_10 : f32 to vector<8x7xf32>
    %cst_11 = arith.constant 0.000000e+00 : f32
    %26 = vector.broadcast %cst_11 : f32 to vector<8x49xf32>
    %27 = tpu.concatenate %25, %24, %26 in 1 : vector<8x7xf32>, vector<8x72xf32>, vector<8x49xf32> -> vector<8x128xf32>
    %28 = tpu.concatenate %2, %27 in 0 : vector<16x128xf32>, vector<8x128xf32> -> vector<24x128xf32>
    %c0_12 = arith.constant 0 : index
    %c0_13 = arith.constant 0 : index
    %29 = vector.load %arg4[%c0_12, %c0_13] : memref<16x24xbf16, #tpu.memory_space<vmem>>, vector<16x24xbf16>
    %c0_14 = arith.constant 0 : index
    %c0_15 = arith.constant 0 : index
    %30 = vector.load %arg5[%c0_14, %c0_15] : memref<8x144xbf16, #tpu.memory_space<vmem>>, vector<8x144xbf16>
    %cst_16 = arith.constant 0.000000e+00 : f32
    %31 = vector.broadcast %cst_16 : f32 to vector<24x128xf32>
    %32 = arith.maximumf %28, %31 : vector<24x128xf32>
    %33 = arith.truncf %32 : vector<24x128xf32> to vector<24x128xbf16>
    %cst_17 = arith.constant dense<0.000000e+00> : vector<16x128xf32>
    %34 = tpu.matmul %29, %33, %cst_17 {dimension_numbers = #tpu.dot_dimension_numbers<[1], [0], [0], [1], [0, 0, 1, 1], [], []>} : vector<16x24xbf16>, vector<24x128xbf16>, vector<16x128xf32> -> vector<16x128xf32>
    %cst_18 = arith.constant 0.000000e+00 : f32
    %35 = vector.broadcast %cst_18 : f32 to vector<16x128xf32>
    %36 = arith.maximumf %34, %35 : vector<16x128xf32>
    %37 = arith.truncf %36 : vector<16x128xf32> to vector<16x128xbf16>
    %38 = vector.extract_strided_slice %37 {offsets = [0, 0], sizes = [16, 72], strides = [1, 1]} : vector<16x128xbf16> to vector<16x72xbf16>
    %39 = vector.extract_strided_slice %37 {offsets = [0, 1], sizes = [16, 72], strides = [1, 1]} : vector<16x128xbf16> to vector<16x72xbf16>
    %40 = vector.extract_strided_slice %37 {offsets = [0, 2], sizes = [16, 72], strides = [1, 1]} : vector<16x128xbf16> to vector<16x72xbf16>
    %41 = vector.extract_strided_slice %37 {offsets = [0, 6], sizes = [16, 72], strides = [1, 1]} : vector<16x128xbf16> to vector<16x72xbf16>
    %42 = vector.extract_strided_slice %37 {offsets = [0, 7], sizes = [16, 72], strides = [1, 1]} : vector<16x128xbf16> to vector<16x72xbf16>
    %43 = vector.extract_strided_slice %37 {offsets = [0, 8], sizes = [16, 72], strides = [1, 1]} : vector<16x128xbf16> to vector<16x72xbf16>
    %44 = vector.extract_strided_slice %37 {offsets = [0, 12], sizes = [16, 72], strides = [1, 1]} : vector<16x128xbf16> to vector<16x72xbf16>
    %45 = vector.extract_strided_slice %37 {offsets = [0, 13], sizes = [16, 72], strides = [1, 1]} : vector<16x128xbf16> to vector<16x72xbf16>
    %46 = vector.extract_strided_slice %37 {offsets = [0, 14], sizes = [16, 72], strides = [1, 1]} : vector<16x128xbf16> to vector<16x72xbf16>
    %47 = tpu.concatenate %38, %39, %40, %41, %42, %43, %44, %45, %46 in 0 : vector<16x72xbf16>, vector<16x72xbf16>, vector<16x72xbf16>, vector<16x72xbf16>, vector<16x72xbf16>, vector<16x72xbf16>, vector<16x72xbf16>, vector<16x72xbf16>, vector<16x72xbf16> -> vector<144x72xbf16>
    %cst_19 = arith.constant dense<0.000000e+00> : vector<8x72xf32>
    %48 = tpu.matmul %30, %47, %cst_19 {dimension_numbers = #tpu.dot_dimension_numbers<[1], [0], [0], [1], [0, 0, 1, 1], [], []>} : vector<8x144xbf16>, vector<144x72xbf16>, vector<8x72xf32> -> vector<8x72xf32>
    %49 = vector.broadcast %0 : vector<1x72xf32> to vector<8x72xf32>
    %50 = arith.mulf %48, %49 : vector<8x72xf32>
    %cst_20 = arith.constant 0.000000e+00 : f32
    %51 = vector.broadcast %cst_20 : f32 to vector<8x7xf32>
    %cst_21 = arith.constant 0.000000e+00 : f32
    %52 = vector.broadcast %cst_21 : f32 to vector<8x49xf32>
    %53 = tpu.concatenate %51, %50, %52 in 1 : vector<8x7xf32>, vector<8x72xf32>, vector<8x49xf32> -> vector<8x128xf32>
    %54 = tpu.concatenate %28, %53 in 0 : vector<24x128xf32>, vector<8x128xf32> -> vector<32x128xf32>
    %cst_22 = arith.constant 0.000000e+00 : f32
    %55 = vector.broadcast %cst_22 : f32 to vector<32x128xf32>
    %56 = arith.maximumf %54, %55 : vector<32x128xf32>
    %c0_23 = arith.constant 0 : index
    %c0_24 = arith.constant 0 : index
    %57 = vector.load %arg6[%c0_23, %c0_24] : memref<128x2xf32, #tpu.memory_space<vmem>>, vector<128x2xf32>
    %cst_25 = arith.constant dense<0.000000e+00> : vector<32x2xf32>
    %58 = tpu.matmul %56, %57, %cst_25 {dimension_numbers = #tpu.dot_dimension_numbers<[1], [0], [0], [1], [0, 0, 1, 1], [], []>} : vector<32x128xf32>, vector<128x2xf32>, vector<32x2xf32> -> vector<32x2xf32>
    %c0_26 = arith.constant 0 : index
    %c0_27 = arith.constant 0 : index
    %59 = vector.load %arg7[%c0_26, %c0_27] : memref<10x32xf32, #tpu.memory_space<vmem>>, vector<10x32xf32>
    %cst_28 = arith.constant dense<0.000000e+00> : vector<10x2xf32>
    %60 = tpu.matmul %59, %58, %cst_28 {dimension_numbers = #tpu.dot_dimension_numbers<[1], [0], [0], [1], [0, 0, 1, 1], [], []>} : vector<10x32xf32>, vector<32x2xf32>, vector<10x2xf32> -> vector<10x2xf32>
    %c0_29 = arith.constant 0 : index
    %c0_30 = arith.constant 0 : index
    %61 = vector.load %arg8[%c0_29, %c0_30] : memref<10x1xf32, #tpu.memory_space<vmem>>, vector<10x1xf32>
    %62 = vector.broadcast %61 : vector<10x1xf32> to vector<10x2xf32>
    %63 = arith.addf %60, %62 : vector<10x2xf32>
    %c0_31 = arith.constant 0 : index
    %c0_32 = arith.constant 0 : index
    %64 = vector.load %arg9[%c0_31, %c0_32] : memref<10x2xf32, #tpu.memory_space<vmem>>, vector<10x2xf32>
    tpu.vector_store %arg9[%c0_31, %c0_32], %63 {strides = array<i32>} : memref<10x2xf32, #tpu.memory_space<vmem>>, vector<10x2xf32>,
    return
  }
}

</mosaic_0001>

<bundles_post_ra>
// kernel: densenet_forward.3
= control target key start
LH: loop header
LB: loop body
LE: loop exit
PB: predicated region body
PF: predicated region fallthrough
CT: control target
= control target key end

     0   :  { %vm257_vm0 = vcmask 154624   ;;  %vm261_vm1 = vcmask 1040384   ;;  %vm262_vm2 = vcmask 1041408   ;;  %v958_v27 = vmov 65535   ;;  %s961_s20 = smov 10   ;;  %s962_s21 = smov 11   ;;  %s1294_s0 = inlined_call_operand.vmem [shape: bf16[147,512], index: 0, kind: input, shape index: {}]   ;;  %s1295_s1 = inlined_call_operand.vmem [shape: bf16[16,147], index: 1, kind: input, shape index: {}]   ;;  %s1296_s2 = inlined_call_operand.vmem [shape: bf16[128,256], index: 2, kind: input, shape index: {}]   ;;  %s1297_s3 = inlined_call_operand.vmem [shape: f32[1,200], index: 3, kind: input, shape index: {}]   ;;  %s1298_s4 = inlined_call_operand.vmem [shape: bf16[16,256], index: 4, kind: output, shape index: {}]  }
   0x1   :  { %v873_v0 = vld [vmem:[%s1294_s0 + $0x4] ss:$16 sps:$4 sm:$0xff]   ;;  %v875_v1 = vld [vmem:[%s1294_s0] ss:$16 sps:$4 sm:$0xff]   ;;  %v896_v8 = vld [vmem:[%s1294_s0 + $0xc] ss:$16 sps:$4 sm:$0xff]  }
   0x2   :  { %277 = vmatprep.subr.bf16.mxu0 %v873_v0  ;;  %v876_v2 = vld [vmem:[%s1294_s0 + $0x24] ss:$16 sps:$4 sm:$0xff]   ;;  %v878_v3 = vld [vmem:[%s1294_s0 + $0x20] ss:$16 sps:$4 sm:$0xff]   ;;  %v899_v9 = vld [vmem:[%s1294_s0 + $0x8] ss:$16 sps:$4 sm:$0xff]   ;;  %320 = vmatprep.subr.bf16.mxu1 %v896_v8 }
   0x3   :  { %278 = vmatpush1.bf16.msra.mxu0 %v875_v1  ;;  %v879_v4 = vld [vmem:[%s1294_s0 + $0x44] ss:$16 sps:$4 sm:$0xff]   ;;  %v881_v5 = vld [vmem:[%s1294_s0 + $0x40] ss:$16 sps:$4 sm:$0xff]   ;;  %v902_v11 = vld [vmem:[%s1294_s0 + $0x2c] ss:$16 sps:$4 sm:$0xff]   ;;  %321 = vmatpush1.bf16.msra.mxu1 %v899_v9 }
   0x4   :  { %279 = vmatprep.subr.bf16.mxu0 %v876_v2  ;;  %v882_v6 = vld [vmem:[%s1294_s0 + $0x64] ss:$16 sps:$4 sm:$0xff]   ;;  %v884_v7 = vld [vmem:[%s1294_s0 + $0x60] ss:$16 sps:$4 sm:$0xff]   ;;  %v905_v13 = vld [vmem:[%s1294_s0 + $0x28] ss:$16 sps:$4 sm:$0xff]   ;;  %322 = vmatprep.subr.bf16.mxu1 %v902_v11 }
   0x5   :  { %v885_v10 = vld [vmem:[%s1294_s0 + $0x84] ss:$16 sps:$4 sm:$0xff]   ;;  %v887_v12 = vld [vmem:[%s1294_s0 + $0x80] ss:$16 sps:$4 sm:$0xff]   ;;  %v907_v14 = vld [vmem:[%s1294_s0 + $0x4c] ss:$16 sps:$4 sm:$0xff]  }
   0x6   :  { %v888_v15 = vld [vmem:[%s1294_s0 + $0xa4] ss:$16 sps:$4 sm:$0xff]   ;;  %v890_v17 = vld [vmem:[%s1294_s0 + $0xa0] ss:$16 sps:$4 sm:$0xff]   ;;  %v910_v18 = vld [vmem:[%s1294_s0 + $0x48] ss:$16 sps:$4 sm:$0xff]  }
   0x7   :  { %280 = vmatpush1.bf16.msra.mxu0 %v878_v3  ;;  %v913_v16 = vld [vmem:[%s1295_s1 + $0x4] ss:$8 sps:$4 sm:$0xff]   ;;  %323 = vmatpush1.bf16.msra.mxu1 %v905_v13  ;;  %v893_v21 = vld [vmem:[%s1294_s0 + $0xc0] ss:$16 sps:$4 sm:$0xff]   ;;  %v916_v22 = vld [vmem:[%s1294_s0 + $0x68] ss:$16 sps:$4 sm:$0xff]  }
   0x8   :  { %281 = vmatprep.subr.bf16.mxu0 %v879_v4  ;;  %324 = vmatprep.subr.bf16.mxu1 %v907_v14  ;;  %v914_v19 = vld [vmem:[%s1294_s0 + $0x6c] ss:$16 sps:$4 sm:$0xff]   ;;  %v891_v20 = vld [vmem:[%s1294_s0 + $0xc4] ss:$16 sps:$4 sm:$0xff]   ;;  %v898_v25 = vld [vmem:[%s1294_s0 + $0xe0] ss:$16 sps:$4 sm:$0xff]  }
   0x9   :  { %846 = vmatprep.mubr.msk.bf16.mxu0 %vm257_vm0, %v913_v16  ;;  %847 = vmatprep.mubr.msk.bf16.mxu1 %vm257_vm0, %v913_v16  ;;  %v917_v23 = vld [vmem:[%s1294_s0 + $0x8c] ss:$16 sps:$4 sm:$0xff]   ;;  %v894_v24 = vld [vmem:[%s1294_s0 + $0xe4] ss:$16 sps:$4 sm:$0xff]   ;;  %v263_v28 = vsel %vm261_vm1, 4294967295, %v958_v27  ;;  %v959_v3 = vmov 0  }
   0xa   :  { %v56_v26 = vld [vmem:[%s1294_s0 + $0x120] sm:$0x33]  ;;  %v919_v29 = vld [vmem:[%s1294_s0 + $0x88] ss:$16 sps:$4 sm:$0xff]   ;;  %v920_v30 = vld [vmem:[%s1294_s0 + $0xac] ss:$16 sps:$4 sm:$0xff]  }
   0xb   :  { %282 = vmatpush1.bf16.msra.mxu0 %v881_v5  ;;  %325 = vmatpush1.bf16.msra.mxu1 %v910_v18  ;;  %v900_v31 = vld [vmem:[%s1294_s0 + $0x104] ss:$16 sps:$4 sm:$0xff]   ;;  %v843_v32 = vcombine.high %v56_v26, %v56_v26  ;;  %v904_v33 = vld [vmem:[%s1294_s0 + $0x100] ss:$16 sps:$4 sm:$0xff]   ;;  %v264_v34 = vsel %vm262_vm2, %v263_v28, 0  ;;  %v842_v36 = vcombine.low %v56_v26, %v56_v26  ;;  %vm659_vm3 = vcmask 7168  }
   0xc   :  { %283 = vmatprep.subr.bf16.mxu0 %v882_v6  ;;  %326 = vmatprep.subr.bf16.mxu1 %v914_v19  ;;  %v922_v35 = vld [vmem:[%s1294_s0 + $0xa8] ss:$16 sps:$4 sm:$0xff]   ;;  %v923_v37 = vld [vmem:[%s1294_s0 + $0xcc] ss:$16 sps:$4 sm:$0xff]   ;;  %vm686_vm4 = vcmask 80896   ;;  %vm749_vm5 = vcmask 89088  }
   0xd   :  { %v269_v38 = vand.u32 %v843_v32, %v264_v34  ;;  %v925_v39 = vld [vmem:[%s1294_s0 + $0xc8] ss:$16 sps:$4 sm:$0xff]   ;;  %v266_v40 = vand.u32 %v842_v36, %v264_v34  ;;  %v926_v41 = vld [vmem:[%s1294_s0 + $0xec] ss:$16 sps:$4 sm:$0xff]   ;;  %vm783_vm6 = vcmask 678912  }
   0xe   :  { %v57_v42 = vld [vmem:[%s1294_s0 + $0x128] sm:$0x33]  ;;  %v1119_v49 = vld [vmem:[%s1296_s2 + $0x14] ss:$8 sps:$4 sm:$0xff]   ;;  %v1128_v53 = vld [vmem:[%s1296_s2 + $0x10] ss:$8 sps:$4 sm:$0xff]  }
   0xf   :  { %284 = vmatpush1.bf16.msra.mxu0 %v884_v7  ;;  %327 = vmatpush1.bf16.msra.mxu1 %v916_v22  ;;  %v1099_v43 = vld [vmem:[%s1296_s2 + $0x4] ss:$8 sps:$4 sm:$0xff]   ;;  %v911_v44 = vld [vmem:[%s1295_s1] ss:$8 sps:$4 sm:$0xff]   ;;  %v845_v47 = vcombine.high %v57_v42, %v57_v42  ;;  %v844_v51 = vcombine.low %v57_v42, %v57_v42  ;;  %v1146_v57 = vld [vmem:[%s1296_s2 + $0x34] ss:$8 sps:$4 sm:$0xff]  }
  0x10   :  { %285 = vmatprep.subr.bf16.mxu0 %v885_v10  ;;  %328 = vmatprep.subr.bf16.mxu1 %v917_v23  ;;  %v928_v45 = vld [vmem:[%s1294_s0 + $0xe8] ss:$16 sps:$4 sm:$0xff]   ;;  %v929_v46 = vld [vmem:[%s1294_s0 + $0x10c] ss:$16 sps:$4 sm:$0xff]  }
  0x11   :  { %v1113_v48 = vld [vmem:[%s1296_s2] ss:$8 sps:$4 sm:$0xff]   ;;  %v275_v52 = vand.u32 %v845_v47, %v264_v34  ;;  %v1134_v54 = vld [vmem:[%s1296_s2 + $0x24] ss:$8 sps:$4 sm:$0xff]   ;;  %v272_v55 = vand.u32 %v844_v51, %v264_v34  ;;  %v1153_v58 = vld [vmem:[%s1296_s2 + $0x30] ss:$8 sps:$4 sm:$0xff]  }
  0x12   :  { %v931_v50 = vld [vmem:[%s1294_s0 + $0x108] ss:$16 sps:$4 sm:$0xff]   ;;  %v1159_v59 = vld [vmem:[%s1296_s2 + $0x44] ss:$8 sps:$4 sm:$0xff]   ;;  %v1173_v61 = vld [vmem:[%s1296_s2 + $0x54] ss:$8 sps:$4 sm:$0xff]  }
  0x13   :  { %286 = vmatpush1.bf16.msra.mxu0 %v887_v12  ;;  %329 = vmatpush1.bf16.msra.mxu1 %v919_v29  ;;  %v1140_v56 = vld [vmem:[%s1296_s2 + $0x20] ss:$8 sps:$4 sm:$0xff]   ;;  %v1181_v62 = vld [vmem:[%s1296_s2 + $0x50] ss:$8 sps:$4 sm:$0xff]   ;;  %v1187_v63 = vld [vmem:[%s1296_s2 + $0x64] ss:$8 sps:$4 sm:$0xff]  }
  0x14   :  { %287 = vmatprep.subr.bf16.mxu0 %v888_v15  ;;  %330 = vmatprep.subr.bf16.mxu1 %v920_v30  ;;  %v1167_v60 = vld [vmem:[%s1296_s2 + $0x40] ss:$8 sps:$4 sm:$0xff]   ;;  %v955_v1 = vld [vmem:[%s1296_s2 + $0x74] ss:$8 sps:$4 sm:$0xff]   ;;  %v957_v2 = vld [vmem:[%s1296_s2 + $0x70] ss:$8 sps:$4 sm:$0xff]  }
  0x15   :  { %v1195_v0 = vld [vmem:[%s1296_s2 + $0x60] ss:$8 sps:$4 sm:$0xff]   ;;  %s960_s2 = smov 1  }
  0x16   :  { %v760_v47 = vld [vmem:[%s1297_s3] sm:$0x3] }
  0x17   :  { %288 = vmatpush1.bf16.msra.mxu0 %v890_v17  ;;  %331 = vmatpush1.bf16.msra.mxu1 %v922_v35 }
  0x18   :  { %289 = vmatprep.subr.bf16.mxu0 %v891_v20  ;;  %332 = vmatprep.subr.bf16.mxu1 %v923_v37 }
  0x1b   :  { %290 = vmatpush1.bf16.msra.mxu0 %v893_v21  ;;  %333 = vmatpush1.bf16.msra.mxu1 %v925_v39 }
  0x1c   :  { %291 = vmatprep.subr.bf16.mxu0 %v894_v24  ;;  %334 = vmatprep.subr.bf16.mxu1 %v926_v41 }
  0x1f   :  { %292 = vmatpush1.bf16.msra.mxu0 %v898_v25  ;;  %335 = vmatpush1.bf16.msra.mxu1 %v928_v45 }
  0x20   :  { %293 = vmatprep.subr.bf16.mxu0 %v900_v31  ;;  %336 = vmatprep.subr.bf16.mxu1 %v929_v46 }
  0x23   :  { %294 = vmatpush1.bf16.msra.mxu0 %v904_v33  ;;  %337 = vmatpush1.bf16.msra.mxu1 %v931_v50 }
  0x24   :  { %295 = vmatprep.subr.bf16.mxu0 %v269_v38  ;;  %338 = vmatprep.subr.bf16.mxu1 %v275_v52 }
  0x27   :  { %296 = vmatpush1.bf16.msra.mxu0 %v266_v40  ;;  %339 = vmatpush1.bf16.msra.mxu1 %v272_v55 }
  0x28   :  { %468 = vmatprep.subr.bf16.mxu0 %v1099_v43  ;;  %512 = vmatprep.subr.bf16.mxu1 %v1099_v43 }
  0x2a   :  { %310 = vmatmul.mubr.bf16.vlgmr.msra.gmra.mrb[0].mxu0 %v911_v44  ;;  %353 = vmatmul.mubr.bf16.vlgmr.msra.gmra.mrb[0].mxu1 %v911_v44  ;;  %v762_v44 = vlaneseq }
  0x2b   :  { %469 = vmatpush1.bf16.msra.mxu0 %v1113_v48  ;;  %513 = vmatpush1.bf16.msra.mxu1 %v1113_v48 }
  0x2c   :  { %470 = vmatprep.subr.bf16.mxu0 %v1119_v49  ;;  %514 = vmatprep.subr.bf16.mxu1 %v1119_v49  ;;  %v763_v45 = vshrl.u32 %v762_v44, 7 }
  0x2d   :  { %500 = vmatprep.mubr.bf16.mxu0 %v959_v3  ;;  %544 = vmatprep.mubr.bf16.mxu1 %v959_v3 }
  0x2e   :  { %v764_v46 = vsub.s32 0, %v763_v45 }
  0x2f   :  { %471 = vmatpush1.bf16.msra.mxu0 %v1128_v53  ;;  %515 = vmatpush1.bf16.msra.mxu1 %v1128_v53 }
  0x30   :  { %472 = vmatprep.subr.bf16.mxu0 %v1134_v54  ;;  %516 = vmatprep.subr.bf16.mxu1 %v1134_v54 }
  0x33   :  { %473 = vmatpush1.bf16.msra.mxu0 %v1140_v56  ;;  %517 = vmatpush1.bf16.msra.mxu1 %v1140_v56 }
  0x34   :  { %474 = vmatprep.subr.bf16.mxu0 %v1146_v57  ;;  %518 = vmatprep.subr.bf16.mxu1 %v1146_v57 }
  0x37   :  { %475 = vmatpush1.bf16.msra.mxu0 %v1153_v58  ;;  %519 = vmatpush1.bf16.msra.mxu1 %v1153_v58 }
  0x38   :  { %476 = vmatprep.subr.bf16.mxu0 %v1159_v59  ;;  %520 = vmatprep.subr.bf16.mxu1 %v1159_v59 }
  0x3b   :  { %477 = vmatpush1.bf16.msra.mxu0 %v1167_v60  ;;  %521 = vmatpush1.bf16.msra.mxu1 %v1167_v60 }
  0x3c   :  { %478 = vmatprep.subr.bf16.mxu0 %v1173_v61  ;;  %522 = vmatprep.subr.bf16.mxu1 %v1173_v61 }
  0x3f   :  { %479 = vmatpush1.bf16.msra.mxu0 %v1181_v62  ;;  %523 = vmatpush1.bf16.msra.mxu1 %v1181_v62 }
  0x40   :  { %480 = vmatprep.subr.bf16.mxu0 %v1187_v63  ;;  %524 = vmatprep.subr.bf16.mxu1 %v1187_v63 }
  0x43   :  { %481 = vmatpush1.bf16.msra.mxu0 %v1195_v0  ;;  %525 = vmatpush1.bf16.msra.mxu1 %v1195_v0 }
  0x44   :  { %482 = vmatprep.subr.bf16.mxu0 %v955_v1  ;;  %526 = vmatprep.subr.bf16.mxu1 %v955_v1 }
  0x47   :  { %483 = vmatpush1.bf16.msra.mxu0 %v957_v2  ;;  %527 = vmatpush1.bf16.msra.mxu1 %v957_v2 }
  0x48   :  { %556 = vmatprep.subr.bf16.mxu0 %v1099_v43  ;;  %600 = vmatprep.subr.bf16.mxu1 %v1099_v43 }
  0xfd   :  { %v311_v4 = vpop.f32.mrb[0].mxu0  ;;  %v354_v14 = vpop.f32.mrb[0].mxu1 }
  0xfe   :  { %v313_v5 = vpop.f32.mrb[1].mxu0  ;;  %v363_v7 = vmax.f32 %v311_v4, 0.0  ;;  %v365_v15 = vmax.f32 %v354_v14, 0.0  ;;  %v356_v16 = vpop.f32.mrb[1].mxu1 }
  0xff   :  { %v315_v6 = vpop.f32.mrb[2].mxu0  ;;  %v364_v10 = vmax.f32 %v313_v5, 0.0  ;;  %v366_v17 = vmax.f32 %v356_v16, 0.0  ;;  %v358_v18 = vpop.f32.mrb[2].mxu1 }
 0x100   :  { %v367_v8 = vmax.f32 %v315_v6, 0.0  ;;  %v317_v9 = vpop.f32.mrb[3].mxu0  ;;  %v369_v19 = vmax.f32 %v358_v18, 0.0  ;;  %v360_v20 = vpop.f32.mrb[3].mxu1 }
 0x101   :  { %v368_v11 = vmax.f32 %v317_v9, 0.0  ;;  %v370_v21 = vmax.f32 %v360_v20, 0.0 }
 0x102   :  { %v371_v12 = vpack.c.bf16 %v367_v8, %v363_v7  ;;  %v555_v22 = vpack.c.bf16 %v369_v19, %v365_v15 }
 0x103   :  { %v511_v13 = vpack.c.bf16 %v368_v11, %v364_v10  ;;  %v599_v23 = vpack.c.bf16 %v370_v21, %v366_v17 }
 0x104   :  { %501 = vmatmul.mubr.bf16.vlgmr.msra.gmra.mrb[4].mxu0 %v371_v12 }
 0x105   :  { %557 = vmatpush1.bf16.msra.mxu0 %v1113_v48  ;;  %545 = vmatmul.mubr.bf16.vlgmr.msra.gmra.mrb[4].mxu1 %v511_v13 }
 0x106   :  { %601 = vmatpush1.bf16.msra.mxu1 %v1113_v48  ;;  %558 = vmatprep.subr.bf16.mxu0 %v1119_v49  ;;  %v768_v48 = vsub.s32 1, %v763_v45 }
 0x107   :  { %602 = vmatprep.subr.bf16.mxu1 %v1119_v49  ;;  %588 = vmatprep.mubr.bf16.mxu0 %v959_v3  ;;  %v765_v49 = vrot.slane %v760_v47, %v764_v46 }
 0x108   :  { %632 = vmatprep.mubr.bf16.mxu1 %v959_v3  ;;  %v769_v50 = vrot.slane %v760_v47, %v768_v48 }
 0x109   :  { %559 = vmatpush1.bf16.msra.mxu0 %v1128_v53 }
 0x10a   :  { %603 = vmatpush1.bf16.msra.mxu1 %v1128_v53  ;;  %560 = vmatprep.subr.bf16.mxu0 %v1134_v54 }
 0x10b   :  { %604 = vmatprep.subr.bf16.mxu1 %v1134_v54 }
 0x10d   :  { %561 = vmatpush1.bf16.msra.mxu0 %v1140_v56 }
 0x10e   :  { %605 = vmatpush1.bf16.msra.mxu1 %v1140_v56  ;;  %562 = vmatprep.subr.bf16.mxu0 %v1146_v57 }
 0x10f   :  { %606 = vmatprep.subr.bf16.mxu1 %v1146_v57 }
 0x111   :  { %563 = vmatpush1.bf16.msra.mxu0 %v1153_v58 }
 0x112   :  { %607 = vmatpush1.bf16.msra.mxu1 %v1153_v58  ;;  %564 = vmatprep.subr.bf16.mxu0 %v1159_v59 }
 0x113   :  { %608 = vmatprep.subr.bf16.mxu1 %v1159_v59 }
 0x115   :  { %565 = vmatpush1.bf16.msra.mxu0 %v1167_v60 }
 0x116   :  { %609 = vmatpush1.bf16.msra.mxu1 %v1167_v60  ;;  %566 = vmatprep.subr.bf16.mxu0 %v1173_v61 }
 0x117   :  { %610 = vmatprep.subr.bf16.mxu1 %v1173_v61 }
 0x119   :  { %567 = vmatpush1.bf16.msra.mxu0 %v1181_v62 }
 0x11a   :  { %611 = vmatpush1.bf16.msra.mxu1 %v1181_v62  ;;  %568 = vmatprep.subr.bf16.mxu0 %v1187_v63 }
 0x11b   :  { %612 = vmatprep.subr.bf16.mxu1 %v1187_v63 }
 0x11d   :  { %569 = vmatpush1.bf16.msra.mxu0 %v1195_v0 }
 0x11e   :  { %613 = vmatpush1.bf16.msra.mxu1 %v1195_v0  ;;  %570 = vmatprep.subr.bf16.mxu0 %v955_v1 }
 0x11f   :  { %614 = vmatprep.subr.bf16.mxu1 %v955_v1 }
 0x121   :  { %571 = vmatpush1.bf16.msra.mxu0 %v957_v2 }
 0x122   :  { %615 = vmatpush1.bf16.msra.mxu1 %v957_v2 }
 0x124   :  { %589 = vmatmul.mubr.bf16.vlgmr.msra.gmra.mrb[8].mxu0 %v555_v22 }
 0x125   :  { %633 = vmatmul.mubr.bf16.vlgmr.msra.gmra.mrb[8].mxu1 %v599_v23 }
 0x1d7   :  { %v502_v24 = vpop.f32.mrb[4].mxu0 }
 0x1d8   :  { %v504_v25 = vpop.f32.mrb[5].mxu0  ;;  %v546_v26 = vpop.f32.mrb[4].mxu1 }
 0x1d9   :  { %v643_v27 = vmax.f32 %v502_v24, %v546_v26  ;;  %v506_v28 = vpop.f32.mrb[6].mxu0  ;;  %651 = vrot.lane.b32.xlu0 %v546_v26, %s960_s2  ;;  %v548_v29 = vpop.f32.mrb[5].mxu1 }
 0x1da   :  { %v644_v30 = vmax.f32 %v504_v25, %v548_v29  ;;  %v508_v31 = vpop.f32.mrb[7].mxu0  ;;  %v550_v32 = vpop.f32.mrb[6].mxu1 }
 0x1db   :  { %v645_v33 = vmax.f32 %v506_v28, %v550_v32  ;;  %655 = vrot.lane.b32.xlu1 %v550_v32, %s960_s2  ;;  %v552_v34 = vpop.f32.mrb[7].mxu1 }
 0x1dc   :  { %v646_v35 = vmax.f32 %v508_v31, %v552_v34 }
 0x1dd   :  { %653 = vrot.lane.b32.xlu0 %v548_v29, %s960_s2 }
 0x1df   :  { %657 = vrot.lane.b32.xlu1 %v552_v34, %s960_s2 }
 0x1f7   :  { %v590_v36 = vpop.f32.mrb[8].mxu0 }
 0x1f8   :  { %v592_v37 = vpop.f32.mrb[9].mxu0  ;;  %678 = vrot.lane.b32.xlu0 %v590_v36, %s961_s20  ;;  %v1244_v38 = vpop.f32.mrb[8].mxu1 }
 0x1f9   :  { %v594_v39 = vpop.f32.mrb[10].mxu0  ;;  %680 = vrot.lane.b32.xlu1 %v592_v37, %s961_s20  ;;  %v1246_v40 = vpop.f32.mrb[9].mxu1 }
 0x1fa   :  { %v596_v41 = vpop.f32.mrb[11].mxu0  ;;  %v1248_v42 = vpop.f32.mrb[10].mxu1 }
 0x1fb   :  { %v1250_v43 = vpop.f32.mrb[11].mxu1 }
 0x1fc   :  { %705 = vrot.lane.b32.xlu0 %v1244_v38, %s960_s2 }
 0x1fd   :  { %707 = vrot.lane.b32.xlu1 %v1246_v40, %s960_s2 }
 0x200   :  { %723 = vrot.lane.b32.xlu0 %v1244_v38, %s961_s20 }
 0x201   :  { %725 = vrot.lane.b32.xlu1 %v1246_v40, %s961_s20 }
 0x204   :  { %741 = vrot.lane.b32.xlu0 %v1244_v38, %s962_s21 }
 0x205   :  { %743 = vrot.lane.b32.xlu1 %v1246_v40, %s962_s21 }
 0x208   :  { %682 = vrot.lane.b32.xlu0 %v594_v39, %s961_s20 }
 0x209   :  { %684 = vrot.lane.b32.xlu1 %v596_v41, %s961_s20 }
 0x20c   :  { %709 = vrot.lane.b32.xlu0 %v1248_v42, %s960_s2 }
 0x20d   :  { %711 = vrot.lane.b32.xlu1 %v1250_v43, %s960_s2 }
 0x210   :  { %727 = vrot.lane.b32.xlu0 %v1248_v42, %s961_s20 }
 0x211   :  { %729 = vrot.lane.b32.xlu1 %v1250_v43, %s961_s20 }
 0x214   :  { %745 = vrot.lane.b32.xlu0 %v1248_v42, %s962_s21 }
 0x215   :  { %747 = vrot.lane.b32.xlu1 %v1250_v43, %s962_s21 }
 0x218   :  { %770 = vrot.lane.b32.xlu0 %v765_v49, %s962_s21 }
 0x219   :  { %772 = vrot.lane.b32.xlu1 %v769_v50, %s962_s21 }
 0x24b   :  { %v652_v51 = vpop.permute.xlu0 %651 }
 0x24c   :  { %v666_v52 = vmax.f32 %v643_v27, %v652_v51 }
 0x24d   :  { %v656_v53 = vpop.permute.xlu1 %655 }
 0x24e   :  { %v668_v54 = vmax.f32 %v645_v33, %v656_v53  ;;  %v670_v55 = vmax.f32 %v666_v52, %v590_v36 }
 0x24f   :  { %v654_v56 = vpop.permute.xlu0 %653 }
 0x250   :  { %v660_v57 = vsel %vm659_vm3, %v652_v51, %v654_v56  ;;  %v672_v58 = vmax.f32 %v668_v54, %v594_v39 }
 0x251   :  { %v667_v59 = vmax.f32 %v644_v30, %v660_v57  ;;  %v658_v60 = vpop.permute.xlu1 %657 }
 0x252   :  { %v661_v61 = vsel %vm659_vm3, %v656_v53, %v658_v60 }
 0x253   :  { %v669_v62 = vmax.f32 %v646_v35, %v661_v61  ;;  %v671_v63 = vmax.f32 %v667_v59, %v592_v37 }
 0x255   :  { %v673_v0 = vmax.f32 %v669_v62, %v596_v41 }
 0x26a   :  { %v679_v1 = vpop.permute.xlu0 %678 }
 0x26b   :  { %v693_v2 = vmax.f32 %v670_v55, %v679_v1  ;;  %v681_v3 = vpop.permute.xlu1 %680 }
 0x26c   :  { %v687_v4 = vsel %vm686_vm4, %v679_v1, %v681_v3 }
 0x26d   :  { %v694_v5 = vmax.f32 %v671_v63, %v687_v4  ;;  %v697_v6 = vmax.f32 %v693_v2, %v1244_v38 }
 0x26e   :  { %v706_v7 = vpop.permute.xlu0 %705 }
 0x26f   :  { %v708_v8 = vpop.permute.xlu1 %707  ;;  %v698_v9 = vmax.f32 %v694_v5, %v1246_v40  ;;  %v719_v27 = vmax.f32 %v697_v6, %v706_v7 }
 0x270   :  { %v713_v25 = vsel %vm659_vm3, %v706_v7, %v708_v8 }
 0x271   :  { %v720_v32 = vmax.f32 %v698_v9, %v713_v25 }
 0x272   :  { %v724_v10 = vpop.permute.xlu0 %723 }
 0x273   :  { %v726_v11 = vpop.permute.xlu1 %725  ;;  %v737_v33 = vmax.f32 %v719_v27, %v724_v10 }
 0x274   :  { %v731_v29 = vsel %vm686_vm4, %v724_v10, %v726_v11 }
 0x275   :  { %v738_v39 = vmax.f32 %v720_v32, %v731_v29 }
 0x276   :  { %v742_v12 = vpop.permute.xlu0 %741 }
 0x277   :  { %v744_v13 = vpop.permute.xlu1 %743  ;;  %v756_v40 = vmax.f32 %v737_v33, %v742_v12 }
 0x278   :  { %v750_v37 = vsel %vm749_vm5, %v742_v12, %v744_v13 }
 0x279   :  { %v757_v44 = vmax.f32 %v738_v39, %v750_v37 }
 0x27a   :  { %v683_v14 = vpop.permute.xlu0 %682 }
 0x27b   :  { %v695_v15 = vmax.f32 %v672_v58, %v683_v14  ;;  %v685_v16 = vpop.permute.xlu1 %684 }
 0x27c   :  { %v688_v17 = vsel %vm686_vm4, %v683_v14, %v685_v16 }
 0x27d   :  { %v696_v18 = vmax.f32 %v673_v0, %v688_v17  ;;  %v699_v19 = vmax.f32 %v695_v15, %v1248_v42 }
 0x27e   :  { %v710_v20 = vpop.permute.xlu0 %709 }
 0x27f   :  { %v712_v21 = vpop.permute.xlu1 %711  ;;  %v700_v22 = vmax.f32 %v696_v18, %v1250_v43  ;;  %v721_v28 = vmax.f32 %v699_v19, %v710_v20 }
 0x280   :  { %v714_v26 = vsel %vm659_vm3, %v710_v20, %v712_v21 }
 0x281   :  { %v722_v34 = vmax.f32 %v700_v22, %v714_v26 }
 0x282   :  { %v728_v23 = vpop.permute.xlu0 %727 }
 0x283   :  { %v730_v24 = vpop.permute.xlu1 %729  ;;  %v739_v35 = vmax.f32 %v721_v28, %v728_v23 }
 0x284   :  { %v732_v30 = vsel %vm686_vm4, %v728_v23, %v730_v24 }
 0x285   :  { %v740_v41 = vmax.f32 %v722_v34, %v732_v30 }
 0x286   :  { %v746_v31 = vpop.permute.xlu0 %745 }
 0x287   :  { %v748_v36 = vpop.permute.xlu1 %747  ;;  %v758_v42 = vmax.f32 %v739_v35, %v746_v31 }
 0x288   :  { %v751_v38 = vsel %vm749_vm5, %v746_v31, %v748_v36 }
 0x289   :  { %v759_v45 = vmax.f32 %v740_v41, %v751_v38 }
 0x28a   :  { %v771_v43 = vpop.permute.xlu0 %770 }
 0x28b   :  { %v777_v46 = vmul.f32 %v771_v43, %v756_v40  ;;  %v779_v47 = vmul.f32 %v771_v43, %v758_v42  ;;  %v773_v48 = vpop.permute.xlu1 %772 }
 0x28c   :  { %v774_v49 = vsel %vm749_vm5, %v771_v43, %v773_v48 }
 0x28d   :  { %v778_v50 = vmul.f32 %v774_v49, %v757_v44  ;;  %v780_v51 = vmul.f32 %v774_v49, %v759_v45  ;;  %v781_v52 = vsel %vm749_vm5, 0.0, %v777_v46  ;;  %v782_v53 = vsel %vm749_vm5, 0.0, %v779_v47 }
 0x28f   :  { %v784_v54 = vsel %vm783_vm6, %v778_v50, 0.0  ;;  %v785_v55 = vsel %vm783_vm6, %v780_v51, 0.0 }
 0x290   :  { %v866_v56 = vpack.c.bf16 %v784_v54, %v781_v52  ;;  %v867_v57 = vpack.c.bf16 %v785_v55, %v782_v53 }
 0x292   :  { %798 = vst [vmem:[%s1298_s4] sm:$0xff] %v866_v56  ;;  %799 = vst [vmem:[%s1298_s4 + $0x8] sm:$0xff] %v867_v57 }

// kernel: densenet_forward.4
= control target key start
LH: loop header
LB: loop body
LE: loop exit
PB: predicated region body
PF: predicated region fallthrough
CT: control target
= control target key end

     0   :  { %v810_v2 = vmov 0   ;;  %vm51_vm0 = vcmask 130048   ;;  %s813_s11 = smov 118   ;;  %s814_s12 = smov 117   ;;  %vm110_vm1 = vcmask 1039360   ;;  %vm118_vm2 = vcmask 1031168   ;;  %s1029_s0 = inlined_call_operand.vmem [shape: bf16[16,256], index: 0, kind: input, shape index: {}]   ;;  %s1030_s2 = inlined_call_operand.vmem [shape: bf16[16,16], index: 2, kind: input, shape index: {}]   ;;  %s1031_s3 = inlined_call_operand.vmem [shape: bf16[8,144], index: 3, kind: input, shape index: {}]   ;;  %s1032_s1 = inlined_call_operand.vmem [shape: f32[1,200], index: 1, kind: input, shape index: {}]   ;;  %s1033_s4 = inlined_call_operand.vmem [shape: bf16[16,24], index: 4, kind: input, shape index: {}]   ;;  %s1034_s5 = inlined_call_operand.vmem [shape: bf16[8,144], index: 5, kind: input, shape index: {}]   ;;  %s1035_s6 = inlined_call_operand.vmem [shape: bf16[256,128], index: 6, kind: input, shape index: {}]   ;;  %s1036_s7 = inlined_call_operand.vmem [shape: bf16[16,32], index: 7, kind: input, shape index: {}]   ;;  %s1037_s8 = inlined_call_operand.vmem [shape: bf16[16,128], index: 8, kind: output, shape index: {}]  }
   0x1   :  { %v31_v0 = vld [vmem:[%s1029_s0] sm:$0xff]  ;;  %v32_v1 = vld [vmem:[%s1029_s0 + $0x8] sm:$0xff]  ;;  %87 = vmatprep.mubr.bf16.mxu0 %v810_v2  ;;  %s811_s0 = smov 126   ;;  %s815_s13 = smov 116   ;;  %vm126_vm3 = vcmask 965632   ;;  %vm134_vm4 = vcmask 957440   ;;  %v221_v51 = vlaneseq }
   0x2   :  { %v34_v3 = vunpack.c.h.bf16 %v31_v0  ;;  %v36_v4 = vunpack.c.h.bf16 %v32_v1  ;;  %v33_v5 = vunpack.c.l.bf16 %v31_v0  ;;  %v35_v6 = vunpack.c.l.bf16 %v32_v1  ;;  %v787_v13 = vld [vmem:[%s1030_s2] sm:$0xff]   ;;  %s812_s2 = smov 127   ;;  %s816_s16 = smov 108  }
   0x3   :  { %v39_v24 = vld [vmem:[%s1031_s3] sm:$0xff]  ;;  %s817_s17 = smov 107   ;;  %s818_s18 = smov 106   ;;  %vm142_vm5 = vcmask 949248   ;;  %vm150_vm6 = vcmask 883712   ;;  %vm158_vm7 = vcmask 875520  }
   0x4   :  { %v41_v7 = vmax.f32 %v34_v3, 0.0  ;;  %v43_v8 = vmax.f32 %v36_v4, 0.0  ;;  %v40_v9 = vmax.f32 %v33_v5, 0.0  ;;  %v42_v10 = vmax.f32 %v35_v6, 0.0  ;;  %v30_v54 = vld [vmem:[%s1032_s1] sm:$0x3] }
   0x5   :  { %v691_v25 = vcombine.high %v39_v24, %v39_v24  ;;  %vm166_vm8 = vcmask 867328   ;;  %v690_v50 = vcombine.low %v39_v24, %v39_v24  ;;  %v222_v52 = vshrl.u32 %v221_v51, 7  ;;  %s819_s20 = smov 11   ;;  %v248_v24 = vld [vmem:[%s1034_s5] sm:$0xff] }
   0x6   :  { %v873_v11 = vpack.c.bf16 %v43_v8, %v41_v7  ;;  %v875_v12 = vpack.c.bf16 %v42_v10, %v40_v9  ;;  %vm239_vm9 = vcmask 89088   ;;  %vm244_vm10 = vcmask 678912   ;;  %v793_v51 = vld [vmem:[%s1035_s6 + $0x40] sm:$0xff]  }
   0x7   :  { %692 = vmatprep.mubr.msk.bf16.mxu1 %vm51_vm0, %v691_v25  ;;  %v223_v53 = vsub.s32 0, %v222_v52  ;;  %v227_v55 = vsub.s32 1, %v222_v52  ;;  %vm262_vm11 = vcmask 1043456   ;;  %vm258_vm12 = vcmask 195584   ;;  %v794_v52 = vld [vmem:[%s1035_s6] sm:$0xff]  }
   0x8   :  { %55 = vmatprep.subr.bf16.mxu0 %v873_v11  ;;  %v697_v25 = vcombine.high %v248_v24, %v248_v24  ;;  %vm821_vm13 = vmmov 0   ;;  %vm629_vm14 = vcmask 261120  }
   0x9   :  { %56 = vmatpush1.bf16.msra.mxu0 %v875_v12  ;;  %v917_v56 = vrot.slane %v30_v54, %v223_v53  ;;  %v919_v57 = vrot.slane %v30_v54, %v227_v55  ;;  %v795_v53 = vld [vmem:[%s1035_s6 + $0x48] sm:$0xff]   ;;  %v797_v55 = vld [vmem:[%s1035_s6 + $0x50] sm:$0xff]  }
   0xa   :  { %269 = vmatprep.subr.bf16.mxu0 %v873_v11  ;;  %v796_v54 = vld [vmem:[%s1035_s6 + $0x8] sm:$0xff]  }
   0xc   :  { %689 = vmatmul.mubr.msk.bf16.vlgmr.msra.gmra.mrb[0].mxu0 %vm51_vm0, %v787_v13  ;;  %v790_v13 = vld [vmem:[%s1033_s4] sm:$0xff]  }
   0xd   :  { %270 = vmatpush1.bf16.msra.mxu0 %v875_v12  ;;  %301 = vmatprep.mubr.bf16.mxu0 %v810_v2 }
  0xdf   :  { %v89_v14 = vpop.f32.mrb[0].mxu0 }
  0xe0   :  { %v91_v15 = vpop.f32.mrb[1].mxu0  ;;  %v98_v17 = vmax.f32 %v89_v14, 0.0 }
  0xe1   :  { %v93_v16 = vpop.f32.mrb[2].mxu0  ;;  %v99_v20 = vmax.f32 %v91_v15, 0.0 }
  0xe2   :  { %v100_v18 = vmax.f32 %v93_v16, 0.0  ;;  %v95_v19 = vpop.f32.mrb[3].mxu0 }
  0xe3   :  { %v101_v21 = vmax.f32 %v95_v19, 0.0 }
  0xe4   :  { %v102_v22 = vpack.c.bf16 %v100_v18, %v98_v17 }
  0xe5   :  { %v103_v23 = vpack.c.bf16 %v101_v21, %v99_v20 }
  0xe6   :  { %114 = vrot.lane.b32.xlu1 %v102_v22, %s811_s0  ;;  %106 = vrot.lane.b32.xlu0 %v102_v22, %s812_s2 }
  0xe7   :  { %179 = vmatprep.subr.bf16.mxu1 %v103_v23 }
  0xe8   :  { %180 = vmatpush1.bf16.msra.mxu1 %v102_v22 }
  0xea   :  { %116 = vrot.lane.b32.xlu1 %v103_v23, %s811_s0  ;;  %108 = vrot.lane.b32.xlu0 %v103_v23, %s812_s2 }
  0xee   :  { %124 = vrot.lane.b32.xlu1 %v103_v23, %s813_s11  ;;  %122 = vrot.lane.b32.xlu0 %v102_v22, %s813_s11 }
  0xf2   :  { %132 = vrot.lane.b32.xlu1 %v103_v23, %s814_s12  ;;  %130 = vrot.lane.b32.xlu0 %v102_v22, %s814_s12 }
  0xf6   :  { %140 = vrot.lane.b32.xlu1 %v103_v23, %s815_s13  ;;  %138 = vrot.lane.b32.xlu0 %v102_v22, %s815_s13 }
  0xfa   :  { %148 = vrot.lane.b32.xlu1 %v103_v23, %s816_s16  ;;  %146 = vrot.lane.b32.xlu0 %v102_v22, %s816_s16 }
  0xfe   :  { %156 = vrot.lane.b32.xlu1 %v103_v23, %s817_s17  ;;  %154 = vrot.lane.b32.xlu0 %v102_v22, %s817_s17 }
 0x102   :  { %164 = vrot.lane.b32.xlu1 %v103_v23, %s818_s18  ;;  %162 = vrot.lane.b32.xlu0 %v102_v22, %s818_s18 }
 0x158   :  { %v115_v26 = vpop.permute.xlu1 %114  ;;  %v107_v27 = vpop.permute.xlu0 %106 }
 0x15c   :  { %v117_v28 = vpop.permute.xlu1 %116  ;;  %v109_v29 = vpop.permute.xlu0 %108 }
 0x15d   :  { %181 = vmatprep.subr.bf16.mxu1 %v109_v29  ;;  %v111_v30 = vsel %vm110_vm1, %v107_v27, %v109_v29  ;;  %v119_v33 = vsel %vm118_vm2, %v115_v26, %v117_v28 }
 0x15e   :  { %182 = vmatpush1.bf16.msra.mxu1 %v111_v30 }
 0x15f   :  { %183 = vmatprep.subr.bf16.mxu1 %v117_v28 }
 0x160   :  { %v125_v31 = vpop.permute.xlu1 %124  ;;  %v123_v32 = vpop.permute.xlu0 %122 }
 0x161   :  { %v127_v36 = vsel %vm126_vm3, %v123_v32, %v125_v31 }
 0x162   :  { %184 = vmatpush1.bf16.msra.mxu1 %v119_v33 }
 0x163   :  { %185 = vmatprep.subr.bf16.mxu1 %v125_v31 }
 0x164   :  { %v133_v34 = vpop.permute.xlu1 %132  ;;  %v131_v35 = vpop.permute.xlu0 %130 }
 0x165   :  { %v135_v39 = vsel %vm134_vm4, %v131_v35, %v133_v34 }
 0x166   :  { %186 = vmatpush1.bf16.msra.mxu1 %v127_v36 }
 0x167   :  { %187 = vmatprep.subr.bf16.mxu1 %v133_v34 }
 0x168   :  { %v141_v37 = vpop.permute.xlu1 %140  ;;  %v139_v38 = vpop.permute.xlu0 %138 }
 0x169   :  { %v143_v42 = vsel %vm142_vm5, %v139_v38, %v141_v37 }
 0x16a   :  { %188 = vmatpush1.bf16.msra.mxu1 %v135_v39 }
 0x16b   :  { %189 = vmatprep.subr.bf16.mxu1 %v141_v37 }
 0x16c   :  { %v149_v40 = vpop.permute.xlu1 %148  ;;  %v147_v41 = vpop.permute.xlu0 %146 }
 0x16d   :  { %v151_v45 = vsel %vm150_vm6, %v147_v41, %v149_v40 }
 0x16e   :  { %190 = vmatpush1.bf16.msra.mxu1 %v143_v42 }
 0x16f   :  { %191 = vmatprep.subr.bf16.mxu1 %v149_v40 }
 0x170   :  { %v157_v43 = vpop.permute.xlu1 %156  ;;  %v155_v44 = vpop.permute.xlu0 %154 }
 0x171   :  { %v159_v46 = vsel %vm158_vm7, %v155_v44, %v157_v43 }
 0x172   :  { %192 = vmatpush1.bf16.msra.mxu1 %v151_v45 }
 0x173   :  { %193 = vmatprep.subr.bf16.mxu1 %v157_v43 }
 0x174   :  { %v165_v47 = vpop.permute.xlu1 %164  ;;  %v163_v48 = vpop.permute.xlu0 %162 }
 0x175   :  { %v167_v49 = vsel %vm166_vm8, %v163_v48, %v165_v47 }
 0x176   :  { %194 = vmatpush1.bf16.msra.mxu1 %v159_v46 }
 0x177   :  { %195 = vmatprep.subr.bf16.mxu1 %v165_v47 }
 0x17a   :  { %196 = vmatpush1.bf16.msra.mxu1 %v167_v49 }
 0x17b   :  { %726 = vmatprep.subr.bf16.mxu1 %v793_v51 }
 0x17d   :  { %212 = vmatmul.mubr.bf16.vlgmr.msra.gmra.mrb[0].mxu1 %v690_v50  ;;  %v696_v50 = vcombine.low %v248_v24, %v248_v24 }
 0x17e   :  { %603 = vmatprep.mubr.bf16.mxu1 %v873_v11  ;;  %727 = vmatpush3.bf16.msra.mxu1 %v794_v52 }
 0x17f   :  { %728 = vmatprep.subr.bf16.mxu1 %v795_v53 }
 0x182   :  { %729 = vmatpush3.bf16.msra.mxu1 %v796_v54 }
 0x183   :  { %730 = vmatprep.subr.bf16.mxu1 %v797_v55 }
 0x250   :  { %v213_v58 = vpop.f32.mrb[0].mxu1 }
 0x251   :  { %v231_v59 = vmul.f32 %v917_v56, %v213_v58  ;;  %v215_v60 = vpop.f32.mrb[1].mxu1  ;;  %v798_v58 = vld [vmem:[%s1035_s6 + $0x10] sm:$0xff]  }
 0x252   :  { %v232_v61 = vmul.f32 %v919_v57, %v215_v60  ;;  %v217_v62 = vpop.f32.mrb[2].mxu1  ;;  %731 = vmatpush3.bf16.msra.mxu1 %v798_v58  ;;  %v800_v60 = vld [vmem:[%s1035_s6 + $0x18] sm:$0xff]  }
 0x253   :  { %v218_v63 = vpop.f32.mrb[3].mxu1  ;;  %v802_v62 = vld [vmem:[%s1035_s6 + $0x20] sm:$0xff]  }
 0x254   :  { %v777_v0 = vpack.i.bf16 %v232_v61, %v231_v59  ;;  %v799_v59 = vld [vmem:[%s1035_s6 + $0x58] sm:$0xff]   ;;  %v801_v61 = vld [vmem:[%s1035_s6 + $0x60] sm:$0xff]   ;;  %v803_v63 = vld [vmem:[%s1035_s6 + $0x68] sm:$0xff]  }
 0x255   :  { %732 = vmatprep.subr.bf16.mxu1 %v799_v59 }
 0x256   :  { %778 = vrot.lane.b32.xlu0 %v777_v0, %s819_s20  ;;  %733 = vmatpush3.bf16.msra.mxu1 %v800_v60  ;;  %v804_v0 = vld [vmem:[%s1035_s6 + $0x28] sm:$0xff]  }
 0x257   :  { %734 = vmatprep.subr.bf16.mxu1 %v801_v61 }
 0x25a   :  { %735 = vmatpush3.bf16.msra.mxu1 %v802_v62 }
 0x25b   :  { %736 = vmatprep.subr.bf16.mxu1 %v803_v63 }
 0x25e   :  { %737 = vmatpush3.bf16.msra.mxu1 %v804_v0 }
 0x2c8   :  { %v779_v1 = vpop.permute.xlu0 %778 }
 0x2c9   :  { %v781_v2 = vunpack.i.h.bf16 %v779_v1  ;;  %v780_v3 = vunpack.i.l.bf16 %v779_v1  ;;  %v805_v1 = vld [vmem:[%s1035_s6 + $0x70] sm:$0xff]  }
 0x2ca   :  { %738 = vmatprep.subr.bf16.mxu1 %v805_v1 }
 0x2cb   :  { %v240_v4 = vsel %vm239_vm9, %v780_v3, %v781_v2  ;;  %v243_v5 = vsel %vm239_vm9, 0.0, %v780_v3  ;;  %v806_v2 = vld [vmem:[%s1035_s6 + $0x30] sm:$0xff]   ;;  %v807_v3 = vld [vmem:[%s1035_s6 + $0x78] sm:$0xff]  }
 0x2cc   :  { %v245_v6 = vsel %vm244_vm10, %v240_v4, 0.0  ;;  %v927_v7 = vmax.f32 %v243_v5, 0.0  ;;  %739 = vmatpush3.bf16.msra.mxu1 %v806_v2  ;;  %v808_v4 = vld [vmem:[%s1035_s6 + $0x38] sm:$0xff]  }
 0x2cd   :  { %v929_v8 = vmax.f32 %v245_v6, 0.0  ;;  %740 = vmatprep.subr.bf16.mxu1 %v807_v3 }
 0x2ce   :  { %v251_v9 = vpack.c.bf16 %v927_v7, %v927_v7 }
 0x2cf   :  { %v252_v10 = vpack.c.bf16 %v929_v8, %v929_v8 }
 0x2d0   :  { %v264_v11 = vsel %vm262_vm11, %v251_v9, 0  ;;  %741 = vmatpush3.bf16.msra.mxu1 %v808_v4 }
 0x2d1   :  { %694 = vmatprep.subr.msk.bf16.mxu0 %vm262_vm11, %v252_v10 }
 0x2d2   :  { %272 = vmatpush1.bf16.msra.mxu0 %v264_v11 }
 0x2d3   :  { %604 = vmatmul.mubr.bf16.vlgmr.msra.gmra.mrb[4].mxu1 %v875_v12 }
 0x2d5   :  { %695 = vmatmul.mubr.msk.bf16.vlgmr.msra.gmra.mrb[4].mxu0 %vm258_vm12, %v790_v13 }
 0x2d6   :  { %698 = vmatprep.mubr.msk.bf16.mxu0 %vm51_vm0, %v697_v25 }
 0x3a8   :  { %v303_v14 = vpop.f32.mrb[4].mxu0 }
 0x3a9   :  { %v305_v15 = vpop.f32.mrb[5].mxu0  ;;  %v312_v17 = vmax.f32 %v303_v14, 0.0  ;;  %v820_v14 = vmov 0.0  }
 0x3aa   :  { %v307_v16 = vpop.f32.mrb[6].mxu0  ;;  %v313_v20 = vmax.f32 %v305_v15, 0.0 }
 0x3ab   :  { %v314_v18 = vmax.f32 %v307_v16, 0.0  ;;  %v309_v19 = vpop.f32.mrb[7].mxu0 }
 0x3ac   :  { %v315_v21 = vmax.f32 %v309_v19, 0.0 }
 0x3ad   :  { %v316_v22 = vpack.c.bf16 %v314_v18, %v312_v17 }
 0x3ae   :  { %v317_v23 = vpack.c.bf16 %v315_v21, %v313_v20  ;;  %v742_v21 = vpop.f32.mrb[4].mxu1 }
 0x3af   :  { %320 = vrot.lane.b32.xlu1 %v316_v22, %s812_s2 }
 0x3b0   :  { %322 = vrot.lane.b32.xlu0 %v317_v23, %s812_s2  ;;  %385 = vmatprep.subr.bf16.mxu0 %v317_v23 }
 0x3b1   :  { %386 = vmatpush1.bf16.msra.mxu0 %v316_v22 }
 0x3b3   :  { %327 = vrot.lane.b32.xlu1 %v316_v22, %s811_s0 }
 0x3b4   :  { %329 = vrot.lane.b32.xlu0 %v317_v23, %s811_s0 }
 0x3b7   :  { %334 = vrot.lane.b32.xlu1 %v316_v22, %s813_s11 }
 0x3b8   :  { %336 = vrot.lane.b32.xlu0 %v317_v23, %s813_s11 }
 0x3bb   :  { %341 = vrot.lane.b32.xlu1 %v316_v22, %s814_s12 }
 0x3bc   :  { %343 = vrot.lane.b32.xlu0 %v317_v23, %s814_s12 }
 0x3bf   :  { %348 = vrot.lane.b32.xlu1 %v316_v22, %s815_s13 }
 0x3c0   :  { %350 = vrot.lane.b32.xlu0 %v317_v23, %s815_s13 }
 0x3c3   :  { %355 = vrot.lane.b32.xlu1 %v316_v22, %s816_s16 }
 0x3c4   :  { %357 = vrot.lane.b32.xlu0 %v317_v23, %s816_s16 }
 0x3c7   :  { %362 = vrot.lane.b32.xlu1 %v316_v22, %s817_s17 }
 0x3c8   :  { %364 = vrot.lane.b32.xlu0 %v317_v23, %s817_s17 }
 0x3cb   :  { %369 = vrot.lane.b32.xlu1 %v316_v22, %s818_s18 }
 0x3cc   :  { %371 = vrot.lane.b32.xlu0 %v317_v23, %s818_s18 }
 0x421   :  { %v321_v26 = vpop.permute.xlu1 %320 }
 0x422   :  { %v323_v27 = vpop.permute.xlu0 %322 }
 0x423   :  { %v324_v28 = vsel %vm110_vm1, %v321_v26, %v323_v27  ;;  %387 = vmatprep.subr.bf16.mxu0 %v323_v27 }
 0x424   :  { %388 = vmatpush1.bf16.msra.mxu0 %v324_v28 }
 0x425   :  { %v328_v29 = vpop.permute.xlu1 %327 }
 0x426   :  { %v330_v30 = vpop.permute.xlu0 %329 }
 0x427   :  { %v331_v31 = vsel %vm118_vm2, %v328_v29, %v330_v30  ;;  %389 = vmatprep.subr.bf16.mxu0 %v330_v30 }
 0x428   :  { %390 = vmatpush1.bf16.msra.mxu0 %v331_v31 }
 0x429   :  { %v335_v32 = vpop.permute.xlu1 %334 }
 0x42a   :  { %v337_v33 = vpop.permute.xlu0 %336 }
 0x42b   :  { %v338_v34 = vsel %vm126_vm3, %v335_v32, %v337_v33  ;;  %391 = vmatprep.subr.bf16.mxu0 %v337_v33 }
 0x42c   :  { %392 = vmatpush1.bf16.msra.mxu0 %v338_v34 }
 0x42d   :  { %v342_v35 = vpop.permute.xlu1 %341 }
 0x42e   :  { %v344_v36 = vpop.permute.xlu0 %343 }
 0x42f   :  { %v345_v37 = vsel %vm134_vm4, %v342_v35, %v344_v36  ;;  %393 = vmatprep.subr.bf16.mxu0 %v344_v36 }
 0x430   :  { %394 = vmatpush1.bf16.msra.mxu0 %v345_v37 }
 0x431   :  { %v349_v38 = vpop.permute.xlu1 %348 }
 0x432   :  { %v351_v39 = vpop.permute.xlu0 %350 }
 0x433   :  { %v352_v40 = vsel %vm142_vm5, %v349_v38, %v351_v39  ;;  %395 = vmatprep.subr.bf16.mxu0 %v351_v39 }
 0x434   :  { %396 = vmatpush1.bf16.msra.mxu0 %v352_v40 }
 0x435   :  { %v356_v41 = vpop.permute.xlu1 %355 }
 0x436   :  { %v358_v42 = vpop.permute.xlu0 %357 }
 0x437   :  { %v359_v43 = vsel %vm150_vm6, %v356_v41, %v358_v42  ;;  %397 = vmatprep.subr.bf16.mxu0 %v358_v42 }
 0x438   :  { %398 = vmatpush1.bf16.msra.mxu0 %v359_v43 }
 0x439   :  { %v363_v44 = vpop.permute.xlu1 %362 }
 0x43a   :  { %v365_v45 = vpop.permute.xlu0 %364 }
 0x43b   :  { %v366_v46 = vsel %vm158_vm7, %v363_v44, %v365_v45  ;;  %399 = vmatprep.subr.bf16.mxu0 %v365_v45 }
 0x43c   :  { %400 = vmatpush1.bf16.msra.mxu0 %v366_v46 }
 0x43d   :  { %v370_v47 = vpop.permute.xlu1 %369 }
 0x43e   :  { %v372_v48 = vpop.permute.xlu0 %371 }
 0x43f   :  { %v373_v49 = vsel %vm166_vm8, %v370_v47, %v372_v48  ;;  %401 = vmatprep.subr.bf16.mxu0 %v372_v48 }
 0x440   :  { %402 = vmatpush1.bf16.msra.mxu0 %v373_v49 }
 0x441   :  { %757 = vmatprep.subr.bf16.mxu0 %v820_v14 }
 0x443   :  { %418 = vmatmul.mubr.bf16.vlgmr.msra.gmra.mrb[8].mxu0 %v696_v50 }
 0x444   :  { %761 = vmatprep.mubr.msk.bf16.mxu0 %vm821_vm13, %v820_v14 }
 0x516   :  { %v419_v5 = vpop.f32.mrb[8].mxu0 }
 0x517   :  { %v426_v6 = vmul.f32 %v419_v5, %v917_v56  ;;  %v421_v9 = vpop.f32.mrb[9].mxu0 }
 0x518   :  { %v427_v10 = vmul.f32 %v421_v9, %v919_v57  ;;  %v423_v11 = vpop.f32.mrb[10].mxu0  ;;  %v743_v57 = vpop.f32.mrb[5].mxu1 }
 0x519   :  { %v424_v13 = vpop.f32.mrb[11].mxu0  ;;  %v744_v23 = vadd.f32 %v743_v57, %v742_v21  ;;  %v745_v24 = vpop.f32.mrb[6].mxu1 }
 0x51a   :  { %v782_v15 = vpack.i.bf16 %v427_v10, %v426_v6  ;;  %v746_v26 = vpop.f32.mrb[7].mxu1 }
 0x51b   :  { %v747_v28 = vadd.f32 %v746_v26, %v745_v24 }
 0x51c   :  { %783 = vrot.lane.b32.xlu1 %v782_v15, %s819_s20 }
 0x51d   :  { %v622_v29 = vpack.c.bf16 %v747_v28, %v744_v23 }
 0x51f   :  { %758 = vmatpush3.bf16.msra.mxu0 %v622_v29 }
 0x520   :  { %759 = vmatprep.subr.bf16.mxu0 %v820_v14 }
 0x58e   :  { %v784_v16 = vpop.permute.xlu1 %783 }
 0x58f   :  { %v786_v17 = vunpack.i.h.bf16 %v784_v16  ;;  %v785_v18 = vunpack.i.l.bf16 %v784_v16 }
 0x591   :  { %v434_v19 = vsel %vm239_vm9, %v785_v18, %v786_v17  ;;  %v437_v12 = vsel %vm239_vm9, 0.0, %v785_v18 }
 0x592   :  { %v438_v20 = vsel %vm244_vm10, %v434_v19, 0.0  ;;  %v439_v56 = vmax.f32 %v437_v12, 0.0 }
 0x593   :  { %v440_v22 = vmax.f32 %v438_v20, 0.0 }
 0x594   :  { %v441_v27 = vpack.c.bf16 %v439_v56, %v927_v7 }
 0x595   :  { %v442_v25 = vpack.c.bf16 %v440_v22, %v929_v8  ;;  %v809_v8 = vld [vmem:[%s1036_s7] sm:$0xff]  }
 0x597   :  { %611 = vmatprep.mubr.bf16.mxu1 %v442_v25 }
 0x598   :  { %612 = vmatmul.mubr.bf16.gmra.mrb[8].mxu1 %v441_v27 }
 0x66b   :  { %v748_v30 = vpop.f32.mrb[8].mxu1 }
 0x66c   :  { %v749_v31 = vpop.f32.mrb[9].mxu1 }
 0x66d   :  { %v750_v32 = vadd.f32 %v749_v31, %v748_v30  ;;  %v751_v33 = vpop.f32.mrb[10].mxu1 }
 0x66e   :  { %v752_v34 = vpop.f32.mrb[11].mxu1 }
 0x66f   :  { %v753_v35 = vadd.f32 %v752_v34, %v751_v33 }
 0x671   :  { %v623_v36 = vpack.c.bf16 %v753_v35, %v750_v32 }
 0x673   :  { %760 = vmatpush3.bf16.msra.mxu0 %v623_v36 }
 0x676   :  { %762 = vmatmul.mubr.msk.bf16.vlgmr.msra.gmra.mrb[12].mxu0 %vm629_vm14, %v809_v8 }
 0x749   :  { %v667_v7 = vpop.f32.mrb[12].mxu0 }
 0x74a   :  { %v763_v37 = vpop.f32.mrb[13].mxu0 }
 0x74b   :  { %v670_v38 = vpop.f32.mrb[14].mxu0 }
 0x74c   :  { %v724_v39 = vpack.c.bf16 %v670_v38, %v667_v7  ;;  %v764_v40 = vpop.f32.mrb[15].mxu0 }
 0x74e   :  { %725 = vst [vmem:[%s1037_s8] sm:$0xff] %v724_v39  }

// kernel: densenet_forward.5
= control target key start
LH: loop header
LB: loop body
LE: loop exit
PB: predicated region body
PF: predicated region fallthrough
CT: control target
= control target key end

     0   :  { %v706_v0 = vmov 0.0   ;;  %vm707_vm0 = vmmov 0   ;;  %vm49_vm1 = vcmask 130048   ;;  %v708_v8 = vmov 0   ;;  %s711_s13 = smov 121   ;;  %s712_s14 = smov 126   ;;  %s909_s0 = inlined_call_operand.vmem [shape: bf16[16,128], index: 0, kind: input, shape index: {}]   ;;  %s910_s2 = inlined_call_operand.vmem [shape: bf16[16,16], index: 2, kind: input, shape index: {}]   ;;  %s911_s3 = inlined_call_operand.vmem [shape: bf16[8,144], index: 3, kind: input, shape index: {}]   ;;  %s912_s6 = inlined_call_operand.vmem [shape: f32[128,2], index: 6, kind: input, shape index: {}]   ;;  %s913_s1 = inlined_call_operand.vmem [shape: f32[1,72], index: 1, kind: input, shape index: {}]   ;;  %s914_s4 = inlined_call_operand.vmem [shape: bf16[16,24], index: 4, kind: input, shape index: {}]   ;;  %s915_s5 = inlined_call_operand.vmem [shape: bf16[8,144], index: 5, kind: input, shape index: {}]   ;;  %s916_s7 = inlined_call_operand.vmem [shape: f32[10,32], index: 7, kind: input, shape index: {}]   ;;  %s917_s8 = inlined_call_operand.vmem [shape: f32[10,1], index: 8, kind: input, shape index: {}]   ;;  %s918_s9 = inlined_call_operand.vmem [shape: f32[10,2], index: 9, kind: output, shape index: {}]  }
   0x1   :  { %583 = vmatprep.subr.bf16.mxu0 %v706_v0  ;;  %v549_v1 = vld [vmem:[%s909_s0] sm:$0xff]   ;;  %585 = vmatprep.mubr.msk.bf16.mxu0 %vm707_vm0, %v706_v0  ;;  %s709_s0 = smov 122   ;;  %s713_s15 = smov 116   ;;  %v331_v28 = vld [vmem:[%s912_s6 + $0x8] sm:$0xff]  ;;  %v332_v29 = vld [vmem:[%s912_s6 + $0x10] sm:$0xff]  ;;  %vm182_vm2 = vcmask 56320  }
   0x2   :  { %v550_v2 = vunpack.c.l.bf16 %v549_v1  ;;  %v551_v3 = vunpack.c.h.bf16 %v549_v1  ;;  %v700_v7 = vld [vmem:[%s910_s2] sm:$0xff]   ;;  %131 = vmatprep.subr.bf16.mxu1 %v708_v8  ;;  %699 = vset.pattern.permute.xlu1 %v708_v8  ;;  %s710_s2 = smov 127   ;;  %s714_s16 = smov 120   ;;  %v333_v31 = vld [vmem:[%s912_s6 + $0x18] sm:$0xff]  ;;  %v335_v34 = vld [vmem:[%s912_s6 + $0x28] sm:$0xff]  ;;  %vm184_vm3 = vcmask 646144  }
   0x3   :  { %698 = vset.pattern.permute.xlu0 %v708_v8  ;;  %s715_s17 = smov 114   ;;  %s716_s18 = smov 115   ;;  %v40_v16 = vld [vmem:[%s911_s3] sm:$0xff]  ;;  %v650_v32 = vpack.c.bf16 %v333_v31, %v332_v29  ;;  %v336_v36 = vld [vmem:[%s912_s6 + $0x30] sm:$0xff]  ;;  %v337_v37 = vld [vmem:[%s912_s6 + $0x38] sm:$0xff]  ;;  %vm200_vm4 = vcmask 1043456  }
   0x4   :  { %v771_v4 = vmax.f32 %v550_v2, 0.0  ;;  %v773_v5 = vmax.f32 %v551_v3, 0.0  ;;  %v538_v17 = vcombine.high %v40_v16, %v40_v16  ;;  %v537_v26 = vcombine.low %v40_v16, %v40_v16  ;;  %v330_v27 = vld [vmem:[%s912_s6] sm:$0xff]  ;;  %v339_v40 = vld [vmem:[%s912_s6 + $0x48] sm:$0xff]  ;;  %v340_v42 = vld [vmem:[%s912_s6 + $0x50] sm:$0xff]  ;;  %s717_s22 = smov 7  }
   0x5   :  { %v646_v30 = vpack.c.bf16 %v331_v28, %v330_v27  ;;  %v334_v33 = vld [vmem:[%s912_s6 + $0x20] sm:$0xff]  ;;  %v658_v38 = vpack.c.bf16 %v337_v37, %v336_v36  ;;  %v341_v43 = vld [vmem:[%s912_s6 + $0x58] sm:$0xff]  ;;  %v343_v46 = vld [vmem:[%s912_s6 + $0x68] sm:$0xff]  ;;  %vm196_vm5 = vcmask 195584   ;;  %vm445_vm6 = vcmask 261120  }
   0x6   :  { %v43_v6 = vpack.c.bf16 %v773_v5, %v771_v4  ;;  %539 = vmatprep.mubr.msk.bf16.mxu1 %vm49_vm1, %v538_v17  ;;  %v654_v35 = vpack.c.bf16 %v335_v34, %v334_v33  ;;  %v338_v39 = vld [vmem:[%s912_s6 + $0x40] sm:$0xff]  ;;  %v666_v44 = vpack.c.bf16 %v341_v43, %v340_v42  ;;  %v344_v48 = vld [vmem:[%s912_s6 + $0x70] sm:$0xff]  ;;  %v345_v49 = vld [vmem:[%s912_s6 + $0x78] sm:$0xff]  ;;  %vm529_vm7 = vcmask 9216  }
   0x7   :  { %v662_v41 = vpack.c.bf16 %v339_v40, %v338_v39  ;;  %v342_v45 = vld [vmem:[%s912_s6 + $0x60] sm:$0xff]  ;;  %v674_v50 = vpack.c.bf16 %v345_v49, %v344_v48  ;;  %v432_v36 = vld [vmem:[%s916_s7 + $0x8] sm:$0x3]  ;;  %vm527_vm8 = vcmask 15360  }
   0x8   :  { %584 = vmatpush3.bf16.msra.mxu0 %v43_v6  ;;  %v670_v47 = vpack.c.bf16 %v343_v46, %v342_v45  ;;  %v857_v51 = vld [vmem:[%s913_s1] ss:$0 sm:$0xff] }
   0x9   :  { %589 = vmatprep.subr.bf16.mxu0 %v706_v0  ;;  %v703_v63 = vld [vmem:[%s914_s4] sm:$0xff]  }
   0xa   :  { %v433_v31 = vld [vmem:[%s917_s8] sm:$0xff] }
   0xb   :  { %586 = vmatmul.mubr.msk.bf16.vlgmr.msra.gmra.mrb[0].mxu0 %vm49_vm1, %v700_v7  ;;  %v188_v7 = vld [vmem:[%s915_s5] sm:$0xff] }
   0xc   :  { %590 = vmatpush3.bf16.msra.mxu0 %v43_v6  ;;  %593 = vmatprep.mubr.msk.bf16.mxu0 %vm707_vm0, %v706_v0 }
   0xd   :  { %591 = vmatprep.subr.bf16.mxu0 %v706_v0 }
  0xde   :  { %v87_v9 = vpop.f32.mrb[0].mxu0 }
  0xdf   :  { %v587_v10 = vpop.f32.mrb[1].mxu0  ;;  %v94_v12 = vmax.f32 %v87_v9, 0.0  ;;  %v544_v9 = vcombine.high %v188_v7, %v188_v7 }
  0xe0   :  { %v90_v11 = vpop.f32.mrb[2].mxu0 }
  0xe1   :  { %v95_v13 = vmax.f32 %v90_v11, 0.0  ;;  %v588_v14 = vpop.f32.mrb[3].mxu0 }
  0xe3   :  { %v96_v15 = vpack.c.bf16 %v95_v13, %v94_v12 }
  0xe5   :  { %104 = vrot.lane.b32.xlu1 %v96_v15, %s709_s0  ;;  %98 = vrot.lane.b32.xlu0 %v96_v15, %s710_s2 }
  0xe6   :  { %132 = vmatpush1.bf16.msra.mxu1 %v96_v15 }
  0xe7   :  { %133 = vmatprep.subr.bf16.mxu1 %v708_v8 }
  0xe9   :  { %107 = vrot.lane.b32.xlu1 %v96_v15, %s711_s13  ;;  %101 = vrot.lane.b32.xlu0 %v96_v15, %s712_s14 }
  0xed   :  { %113 = vrot.lane.b32.xlu1 %v96_v15, %s713_s15  ;;  %110 = vrot.lane.b32.xlu0 %v96_v15, %s714_s16 }
  0xf1   :  { %119 = vrot.lane.b32.xlu1 %v96_v15, %s715_s17  ;;  %116 = vrot.lane.b32.xlu0 %v96_v15, %s716_s18 }
 0x157   :  { %v99_v18 = vpop.permute.xlu0 %98  ;;  %v105_v20 = vpop.permute.xlu1 %104 }
 0x158   :  { %134 = vmatpush1.bf16.msra.mxu1 %v99_v18  ;;  %v543_v18 = vcombine.low %v188_v7, %v188_v7 }
 0x159   :  { %135 = vmatprep.subr.bf16.mxu1 %v708_v8 }
 0x15b   :  { %v102_v19 = vpop.permute.xlu0 %101  ;;  %v108_v21 = vpop.permute.xlu1 %107 }
 0x15c   :  { %136 = vmatpush1.bf16.msra.mxu1 %v102_v19 }
 0x15d   :  { %137 = vmatprep.subr.bf16.mxu1 %v708_v8 }
 0x15f   :  { %v111_v22 = vpop.permute.xlu0 %110  ;;  %v114_v23 = vpop.permute.xlu1 %113 }
 0x160   :  { %138 = vmatpush1.bf16.msra.mxu1 %v105_v20 }
 0x161   :  { %139 = vmatprep.subr.bf16.mxu1 %v708_v8 }
 0x163   :  { %v117_v24 = vpop.permute.xlu0 %116  ;;  %v120_v25 = vpop.permute.xlu1 %119 }
 0x164   :  { %140 = vmatpush1.bf16.msra.mxu1 %v108_v21 }
 0x165   :  { %141 = vmatprep.subr.bf16.mxu1 %v708_v8 }
 0x168   :  { %142 = vmatpush1.bf16.msra.mxu1 %v111_v22 }
 0x169   :  { %143 = vmatprep.subr.bf16.mxu1 %v708_v8 }
 0x16c   :  { %144 = vmatpush1.bf16.msra.mxu1 %v114_v23 }
 0x16d   :  { %145 = vmatprep.subr.bf16.mxu1 %v708_v8 }
 0x170   :  { %146 = vmatpush1.bf16.msra.mxu1 %v117_v24 }
 0x171   :  { %147 = vmatprep.subr.bf16.mxu1 %v708_v8 }
 0x174   :  { %148 = vmatpush1.bf16.msra.mxu1 %v120_v25 }
 0x175   :  { %647 = vmatprep.subr.bf16.mxu1 %v646_v30 }
 0x177   :  { %164 = vmatmul.mubr.bf16.vlgmr.msra.gmra.mrb[0].mxu1 %v537_v26 }
 0x178   :  { %629 = vmatprep.mubr.f32.mxu1 %v771_v4  ;;  %649 = vmatpush3.bf16.msra.mxu1 %v646_v30  ;;  %v431_v30 = vld [vmem:[%s916_s7] sm:$0xff] }
 0x179   :  { %651 = vmatprep.subr.bf16.mxu1 %v650_v32 }
 0x17c   :  { %653 = vmatpush3.bf16.msra.mxu1 %v650_v32  ;;  %v434_v32 = vld [vmem:[%s917_s8 + $0x8] sm:$0x3] }
 0x17d   :  { %655 = vmatprep.subr.bf16.mxu1 %v654_v35 }
 0x180   :  { %657 = vmatpush3.bf16.msra.mxu1 %v654_v35 }
 0x181   :  { %659 = vmatprep.subr.bf16.mxu1 %v658_v38 }
 0x184   :  { %661 = vmatpush3.bf16.msra.mxu1 %v658_v38 }
 0x185   :  { %663 = vmatprep.subr.bf16.mxu1 %v662_v41 }
 0x188   :  { %665 = vmatpush3.bf16.msra.mxu1 %v662_v41 }
 0x189   :  { %667 = vmatprep.subr.bf16.mxu1 %v666_v44 }
 0x18c   :  { %669 = vmatpush3.bf16.msra.mxu1 %v666_v44 }
 0x18d   :  { %671 = vmatprep.subr.bf16.mxu1 %v670_v47 }
 0x190   :  { %673 = vmatpush3.bf16.msra.mxu1 %v670_v47 }
 0x191   :  { %675 = vmatprep.subr.bf16.mxu1 %v674_v50 }
 0x194   :  { %677 = vmatpush3.bf16.msra.mxu1 %v674_v50 }
 0x197   :  { %630 = vmatmul.mubr.f32.vlgmr.msra.gmra.mrb[4].mxu1 %v773_v5 }
 0x24a   :  { %v165_v52 = vpop.f32.mrb[0].mxu1 }
 0x24b   :  { %v177_v53 = vmul.f32 %v857_v51, %v165_v52  ;;  %v167_v54 = vpop.f32.mrb[1].mxu1 }
 0x24c   :  { %v168_v55 = vpop.f32.mrb[2].mxu1 }
 0x24d   :  { %179 = vrot.lane.b32.xlu0 %v177_v53, %s717_s22  ;;  %v169_v56 = vpop.f32.mrb[3].mxu1 }
 0x26a   :  { %v631_v19 = vpop.f32.mrb[4].mxu1 }
 0x26b   :  { %v412_v20 = vpop.f32.mrb[5].mxu1 }
 0x26c   :  { %v678_v21 = vpack.c.bf16 %v631_v19, %v412_v20 }
 0x2bf   :  { %v180_v57 = vpop.permute.xlu0 %179 }
 0x2c0   :  { %v183_v58 = vsel %vm182_vm2, 0.0, %v180_v57 }
 0x2c1   :  { %v185_v59 = vsel %vm184_vm3, %v183_v58, 0.0 }
 0x2c2   :  { %v189_v60 = vmax.f32 %v185_v59, 0.0 }
 0x2c4   :  { %v190_v61 = vpack.c.bf16 %v189_v60, %v189_v60  ;;  %632 = vmatprep.mubr.f32.mxu1 %v189_v60 }
 0x2c6   :  { %v202_v62 = vsel %vm200_vm4, %v190_v61, 0 }
 0x2c7   :  { %592 = vmatpush3.bf16.msra.mxu0 %v202_v62 }
 0x2c8   :  { %282 = vmatprep.subr.bf16.mxu0 %v708_v8 }
 0x2ca   :  { %594 = vmatmul.mubr.msk.bf16.vlgmr.msra.gmra.mrb[4].mxu0 %vm196_vm5, %v703_v63 }
 0x2cb   :  { %545 = vmatprep.mubr.msk.bf16.mxu0 %vm49_vm1, %v544_v9 }
 0x39d   :  { %v238_v0 = vpop.f32.mrb[4].mxu0 }
 0x39e   :  { %v595_v1 = vpop.f32.mrb[5].mxu0  ;;  %v245_v3 = vmax.f32 %v238_v0, 0.0 }
 0x39f   :  { %v241_v2 = vpop.f32.mrb[6].mxu0 }
 0x3a0   :  { %v246_v4 = vmax.f32 %v241_v2, 0.0  ;;  %v596_v5 = vpop.f32.mrb[7].mxu0 }
 0x3a2   :  { %v247_v6 = vpack.c.bf16 %v246_v4, %v245_v3 }
 0x3a4   :  { %252 = vrot.lane.b32.xlu0 %v247_v6, %s712_s14  ;;  %249 = vrot.lane.b32.xlu1 %v247_v6, %s710_s2 }
 0x3a5   :  { %283 = vmatpush1.bf16.msra.mxu0 %v247_v6 }
 0x3a6   :  { %284 = vmatprep.subr.bf16.mxu0 %v708_v8 }
 0x3a8   :  { %258 = vrot.lane.b32.xlu0 %v247_v6, %s711_s13  ;;  %255 = vrot.lane.b32.xlu1 %v247_v6, %s709_s0 }
 0x3ac   :  { %264 = vrot.lane.b32.xlu0 %v247_v6, %s713_s15  ;;  %261 = vrot.lane.b32.xlu1 %v247_v6, %s714_s16 }
 0x3b0   :  { %270 = vrot.lane.b32.xlu0 %v247_v6, %s715_s17  ;;  %267 = vrot.lane.b32.xlu1 %v247_v6, %s716_s18 }
 0x3b4   :  { %437 = vperm.xlu0 %698, %v433_v31  }
 0x416   :  { %v250_v10 = vpop.permute.xlu1 %249  ;;  %v253_v11 = vpop.permute.xlu0 %252 }
 0x417   :  { %285 = vmatpush1.bf16.msra.mxu0 %v250_v10 }
 0x418   :  { %286 = vmatprep.subr.bf16.mxu0 %v708_v8 }
 0x41a   :  { %v256_v12 = vpop.permute.xlu1 %255  ;;  %v259_v13 = vpop.permute.xlu0 %258 }
 0x41b   :  { %287 = vmatpush1.bf16.msra.mxu0 %v253_v11 }
 0x41c   :  { %288 = vmatprep.subr.bf16.mxu0 %v708_v8 }
 0x41e   :  { %v262_v14 = vpop.permute.xlu1 %261  ;;  %v265_v15 = vpop.permute.xlu0 %264 }
 0x41f   :  { %289 = vmatpush1.bf16.msra.mxu0 %v256_v12 }
 0x420   :  { %290 = vmatprep.subr.bf16.mxu0 %v708_v8 }
 0x422   :  { %v268_v16 = vpop.permute.xlu1 %267  ;;  %v271_v17 = vpop.permute.xlu0 %270 }
 0x423   :  { %291 = vmatpush1.bf16.msra.mxu0 %v259_v13 }
 0x424   :  { %292 = vmatprep.subr.bf16.mxu0 %v708_v8 }
 0x427   :  { %293 = vmatpush1.bf16.msra.mxu0 %v262_v14 }
 0x428   :  { %294 = vmatprep.subr.bf16.mxu0 %v708_v8 }
 0x42b   :  { %295 = vmatpush1.bf16.msra.mxu0 %v265_v15 }
 0x42c   :  { %296 = vmatprep.subr.bf16.mxu0 %v708_v8 }
 0x42f   :  { %297 = vmatpush1.bf16.msra.mxu0 %v268_v16 }
 0x430   :  { %298 = vmatprep.subr.bf16.mxu0 %v708_v8 }
 0x433   :  { %299 = vmatpush1.bf16.msra.mxu0 %v271_v17  ;;  %v438_v38 = vpop.permute.xlu0 %437 }
 0x434   :  { %679 = vmatprep.subr.bf16.mxu0 %v678_v21 }
 0x436   :  { %315 = vmatmul.mubr.bf16.vlgmr.msra.gmra.mrb[8].mxu0 %v543_v18 }
 0x437   :  { %681 = vmatpush3.bf16.msra.mxu0 %v678_v21  ;;  %643 = vmatprep.mubr.msk.f32.mxu0 %vm445_vm6, %v431_v30 }
 0x509   :  { %v316_v22 = vpop.f32.mrb[8].mxu0 }
 0x50a   :  { %v322_v23 = vmul.f32 %v857_v51, %v316_v22  ;;  %v318_v24 = vpop.f32.mrb[9].mxu0 }
 0x50b   :  { %v319_v25 = vpop.f32.mrb[10].mxu0 }
 0x50c   :  { %324 = vrot.lane.b32.xlu1 %v322_v23, %s717_s22  ;;  %v320_v26 = vpop.f32.mrb[11].mxu0 }
 0x510   :  { %442 = vperm.xlu1 %699, %v434_v32  }
 0x57e   :  { %v325_v27 = vpop.permute.xlu1 %324 }
 0x57f   :  { %v327_v8 = vsel %vm182_vm2, 0.0, %v325_v27 }
 0x580   :  { %v328_v28 = vsel %vm184_vm3, %v327_v8, 0.0 }
 0x581   :  { %v329_v29 = vmax.f32 %v328_v28, 0.0 }
 0x583   :  { %633 = vmatmul.mubr.f32.gmra.mrb[6].mxu1 %v329_v29 }
 0x58f   :  { %v443_v37 = vpop.permute.xlu1 %442 }
 0x656   :  { %v634_v33 = vpop.f32.mrb[6].mxu1 }
 0x657   :  { %v422_v34 = vpop.f32.mrb[7].mxu1 }
 0x658   :  { %v682_v35 = vpack.c.bf16 %v634_v33, %v422_v34 }
 0x65a   :  { %683 = vmatprep.subr.bf16.mxu0 %v682_v35 }
 0x65b   :  { %685 = vmatpush3.bf16.msra.mxu0 %v682_v35 }
 0x65e   :  { %644 = vmatmul.mubr.msk.f32.vlgmr.msra.gmra.mrb[12].mxu0 %vm445_vm6, %v432_v36 }
 0x731   :  { %v645_v39 = vpop.f32.mrb[12].mxu0 }
 0x732   :  { %v524_v40 = vadd.f32 %v645_v39, %v443_v37  ;;  %v518_v41 = vpop.f32.mrb[13].mxu0 }
 0x733   :  { %v519_v42 = vadd.f32 %v518_v41, %v438_v38 }
 0x734   :  { %530 = vst.msk [vmem:[%s918_s9 + $0x8] sm:$0x3] %vm529_vm7, %v524_v40 }
 0x735   :  { %528 = vst.msk [vmem:[%s918_s9] sm:$0xff] %vm527_vm8, %v519_v42 }

</bundles_post_ra>
